<compile_context>
chip_gen: v5e
topology: v5e:2x2
jax: 0.10.0
libtpu: 0.0.40
codegen_flags: <defaults>
</compile_context>

<pallas_src>
import jax
import jax.numpy as jnp
from jax.experimental import pallas as pl
from jax.experimental.pallas import tpu as pltpu

# ---- RNNConfig (synthetic, deterministic) ----
EMBEDDING_DIM = 32
HIDDEN_DIM = 32
NUM_CLASSES = 2
VOCAB_SIZE = 100

HPAD = 128                       # padded hidden-state lane width: [h_f|h_b|0]
GATES = 2 * HPAD                 # dense gate columns: [r|z] slab + [n] slab
assert 4 * HIDDEN_DIM == HPAD    # slab0 exactly holds r_f|r_b|z_f|z_b


def init_params(key):
    ks = jax.random.split(key, 16)
    k_gru = 1.0 / jnp.sqrt(HIDDEN_DIM)
    k_fc = 1.0 / jnp.sqrt(2.0 * HIDDEN_DIM)

    def u(k, shape, lim):
        return jax.random.uniform(k, shape, jnp.float32, -lim, lim)

    return dict(
        embedding=jax.random.normal(ks[0], (VOCAB_SIZE, EMBEDDING_DIM), jnp.float32),
        # forward direction (gate order [r, z, n], PyTorch convention)
        wih_f=u(ks[1], (3, EMBEDDING_DIM, HIDDEN_DIM), k_gru),
        whh_f=u(ks[2], (3, HIDDEN_DIM, HIDDEN_DIM), k_gru),
        bih_f=u(ks[3], (3, 1, HIDDEN_DIM), k_gru),
        bhh_f=u(ks[4], (3, 1, HIDDEN_DIM), k_gru),
        # backward direction
        wih_b=u(ks[5], (3, EMBEDDING_DIM, HIDDEN_DIM), k_gru),
        whh_b=u(ks[6], (3, HIDDEN_DIM, HIDDEN_DIM), k_gru),
        bih_b=u(ks[7], (3, 1, HIDDEN_DIM), k_gru),
        bhh_b=u(ks[8], (3, 1, HIDDEN_DIM), k_gru),
        # fc: (2H -> C), split into forward / backward halves
        wfc_f=u(ks[9], (HIDDEN_DIM, NUM_CLASSES), k_fc),
        wfc_b=u(ks[10], (HIDDEN_DIM, NUM_CLASSES), k_fc),
        bfc=u(ks[11], (1, NUM_CLASSES), k_fc),
    )


def pack_params(p):
    """One-time host-side repack into fused, lane-dense kernel operands.

    Returns:
      wrz  (2E+128, 256): rows [0:2E] input weights (fwd rows | bwd rows,
                          block-diag over direction), rows [2E:2E+128]
                          recurrent weights over the padded state [h_f|h_b|0].
      wfc  (128, C)     : fused FC over [h_f|h_b|0].
      misc (8, 256)     : row0 = folded input bias, row1 = n-gate recurrent
                          bias (128 lanes), row2 = FC bias (C lanes).
    """
    E, H, C = EMBEDDING_DIM, HIDDEN_DIM, NUM_CLASSES
    R_F, R_B, Z_F, Z_B = 0, H, 2 * H, 3 * H          # slab0 lane offsets
    N_F, N_B = HPAD, HPAD + H                        # slab1 lane offsets

    wih = jnp.zeros((2 * E, GATES), jnp.float32)     # rows: [emb(t) | emb(T-1-t)]
    whh = jnp.zeros((HPAD, GATES), jnp.float32)      # rows: [h_f | h_b | pad]
    bgi = jnp.zeros((GATES,), jnp.float32)
    bhn = jnp.zeros((HPAD,), jnp.float32)

    cols = ((R_F, R_B), (Z_F, Z_B), (N_F, N_B))      # gate order: r, z, n
    for g, (cf, cb) in enumerate(cols):
        wih = wih.at[0:E, cf:cf + H].set(p["wih_f"][g])
        wih = wih.at[E:2 * E, cb:cb + H].set(p["wih_b"][g])
        whh = whh.at[0:H, cf:cf + H].set(p["whh_f"][g])
        whh = whh.at[H:2 * H, cb:cb + H].set(p["whh_b"][g])
        if g < 2:    # r, z: both biases fold into the input projection
            bgi = bgi.at[cf:cf + H].set(p["bih_f"][g, 0] + p["bhh_f"][g, 0])
            bgi = bgi.at[cb:cb + H].set(p["bih_b"][g, 0] + p["bhh_b"][g, 0])
        else:        # n: only bih folds; bhh_n must stay inside r*(.)
            bgi = bgi.at[cf:cf + H].set(p["bih_f"][g, 0])
            bgi = bgi.at[cb:cb + H].set(p["bih_b"][g, 0])
    bhn = bhn.at[0:H].set(p["bhh_f"][2, 0])
    bhn = bhn.at[H:2 * H].set(p["bhh_b"][2, 0])

    wrz = jnp.concatenate([wih, whh], axis=0)        # (2E + 128, 256)

    wfc = jnp.zeros((HPAD, C), jnp.float32)
    wfc = wfc.at[0:H, :].set(p["wfc_f"])
    wfc = wfc.at[H:2 * H, :].set(p["wfc_b"])

    misc = jnp.zeros((8, GATES), jnp.float32)        # all small biases, one DMA
    misc = misc.at[0, :].set(bgi)
    misc = misc.at[1, 0:HPAD].set(bhn)
    misc = misc.at[2, 0:C].set(p["bfc"][0])
    return wrz, wfc, misc


def gru_forward(tokens, emb, wrz, wfc, misc):
    B, T = tokens.shape
    E, H, C = EMBEDDING_DIM, HIDDEN_DIM, NUM_CLASSES
    BP = max(8, ((B + 7) // 8) * 8)          # batch padded to full sublane groups
    TB = T * BP

    def kernel(tok_ref, emb_ref, wrz_ref, wfc_ref, misc_ref, out_ref, xbuf_ref):
        # (0) In-kernel embedding gather + time reversal + direction concat.
        #     xbuf row (t*BP + b) = [ emb[tok[b,t]] | emb[tok[b,T-1-t]] ]
        xbuf_ref[...] = jnp.zeros(xbuf_ref.shape, xbuf_ref.dtype)
        for t in range(T):
            for b in range(B):
                tok = tok_ref[b * T + t]                       # SMEM scalar
                xbuf_ref[pl.ds(t * BP + b, 1), pl.ds(0, E)] = (
                    emb_ref[pl.ds(tok, 1), :])
        for t in range(T):   # backward direction = time-reversed block copy
            xbuf_ref[pl.ds(t * BP, BP), pl.ds(E, E)] = (
                xbuf_ref[pl.ds((T - 1 - t) * BP, BP), pl.ds(0, E)])

        # (1) Hoisted input projection: ONE matmul covers all T steps, both
        #     directions and all 3 gates; biases pre-folded (r,z fully; n: bih).
        wih = wrz_ref[pl.ds(0, 2 * E), :]                      # (2E, 256)
        whh = wrz_ref[pl.ds(2 * E, HPAD), :]                   # (128, 256)
        bgi = misc_ref[pl.ds(0, 1), :]                         # (1, 256)
        gi = jnp.dot(xbuf_ref[...], wih,
                     preferred_element_type=jnp.float32) + bgi  # (T*BP, 256)

        # (2) Hoist loads / broadcasts off the serial recurrence.
        bhn = jnp.broadcast_to(misc_ref[pl.ds(1, 1), pl.ds(0, HPAD)], (BP, HPAD))
        h = jnp.zeros((BP, HPAD), jnp.float32)                 # [h_f | h_b | 0]

        # (3) T-step recurrence, fully unrolled with static, aligned gi slices;
        #     one (BP,128)x(128,256) MXU matmul per step handles both
        #     directions (block-diagonal recurrent weights) and all gates.
        for t in range(T):
            gi_t = gi[t * BP:(t + 1) * BP, :]                  # static slice
            gh = jnp.dot(h, whh, preferred_element_type=jnp.float32)
            s = jax.nn.sigmoid(gi_t[:, 0:HPAD] + gh[:, 0:HPAD])   # [r_f|r_b|z_f|z_b]
            # r (lanes 0:2H of s) is already aligned with the n slab.
            n = jnp.tanh(gi_t[:, HPAD:] + s * (gh[:, HPAD:] + bhn))
            # swap halves so z lands on lanes 0:2H (aligned with h); the r
            # values landing on the pad lanes only ever multiply exact zeros.
            z = pltpu.roll(s, shift=2 * H, axis=1)
            h = (1.0 - z) * n + z * h

        # (4) Fused FC epilogue + log_softmax.
        bfc = misc_ref[pl.ds(2, 1), pl.ds(0, C)]               # (1, C)
        logits = jnp.dot(h, wfc_ref[...], preferred_element_type=jnp.float32) + bfc
        m = jnp.max(logits, axis=1, keepdims=True)
        lse = m + jnp.log(jnp.sum(jnp.exp(logits - m), axis=1, keepdims=True))
        out_ref[...] = (logits - lse)[0:B, :]

    # TODO(synk): for production B/T, tile the batch with a grid axis marked
    # "parallel" (shards across v7x's 2 TensorCores), size tiles for v7x's
    # 64 MiB VMEM, and cast MXU operands (x, wrz, wfc) to bf16 on v6e/v7x
    # while keeping gate/elementwise math in f32 (v5e has no bf16 VPU/EUP).
    vspec = pl.BlockSpec(memory_space=pltpu.MemorySpace.VMEM)
    grid_spec = pltpu.PrefetchScalarGridSpec(
        num_scalar_prefetch=1,                 # tokens -> SMEM before the body
        grid=(),
        in_specs=[vspec, vspec, vspec, vspec],  # emb, wrz, wfc, misc
        out_specs=vspec,
        scratch_shapes=[pltpu.VMEM((TB, 2 * E), jnp.float32)],
    )
    return pl.pallas_call(
        kernel,
        out_shape=jax.ShapeDtypeStruct((B, C), jnp.float32),
        grid_spec=grid_spec,
    )(tokens.reshape(-1), emb, wrz, wfc, misc)


def gru_reference(tokens, params):
    """Pure-JAX reference matching PyTorch nn.GRU(bidirectional) semantics."""
    emb = jnp.take(params["embedding"], tokens, axis=0)
    B, T, _ = emb.shape
    H = HIDDEN_DIM

    def cell(x, h, wih, whh, bih, bhh):
        gi = [x @ wih[g] + bih[g] for g in range(3)]
        gh = [h @ whh[g] + bhh[g] for g in range(3)]
        r = jax.nn.sigmoid(gi[0] + gh[0])
        z = jax.nn.sigmoid(gi[1] + gh[1])
        n = jnp.tanh(gi[2] + r * gh[2])
        return (1.0 - z) * n + z * h

    h_f = jnp.zeros((B, H), jnp.float32)
    h_b = jnp.zeros((B, H), jnp.float32)
    for t in range(T):
        h_f = cell(emb[:, t], h_f, params["wih_f"], params["whh_f"],
                   params["bih_f"], params["bhh_f"])
        h_b = cell(emb[:, T - 1 - t], h_b, params["wih_b"], params["whh_b"],
                   params["bih_b"], params["bhh_b"])
    logits = h_f @ params["wfc_f"] + h_b @ params["wfc_b"] + params["bfc"]
    return jax.nn.log_softmax(logits, axis=1)


if __name__ == "__main__":
    key = jax.random.PRNGKey(0)
    k_tok, k_par = jax.random.split(key)

    B, T = 2, 8
    tokens = jax.random.randint(k_tok, (B, T), 0, VOCAB_SIZE, dtype=jnp.int32)
    params = init_params(k_par)

    # Pack weights ONCE (hoisted out of the per-call path) and jit the wrapper.
    wrz, wfc, misc = pack_params(params)
    emb = params["embedding"]
    fwd = jax.jit(gru_forward)

    out = jax.block_until_ready(fwd(tokens, emb, wrz, wfc, misc))

    ref = gru_reference(tokens, params)
    assert out.shape == (B, NUM_CLASSES)
    assert bool(jnp.all(jnp.isfinite(out)))
    assert bool(jnp.allclose(out, ref, atol=1e-2, rtol=1e-2))

    print("KERNEL_OK")
</pallas_src>

<mosaic_0001>
module attributes {stable_mosaic.version = 11 : i64} {
  func.func @kernel(%arg0: memref<16xi32, #tpu.memory_space<smem>>, %arg1: memref<100x32xf32, #tpu.memory_space<vmem>>, %arg2: memref<192x256xf32, #tpu.memory_space<vmem>>, %arg3: memref<128x2xf32, #tpu.memory_space<vmem>>, %arg4: memref<8x256xf32, #tpu.memory_space<vmem>>, %arg5: memref<2x2xf32, #tpu.memory_space<vmem>>, %arg6: memref<64x64xf32, #tpu.memory_space<vmem>>) attributes {dimension_semantics = [], scalar_prefetch = 1 : i64, scratch_operands = 1 : i64, tpu.core_type = #tpu.core_type<tc>} {
    %cst = arith.constant 0.000000e+00 : f32
    %0 = vector.broadcast %cst : f32 to vector<64x64xf32>
    %c0 = arith.constant 0 : index
    %c0_0 = arith.constant 0 : index
    %1 = vector.load %arg6[%c0, %c0_0] : memref<64x64xf32, #tpu.memory_space<vmem>>, vector<64x64xf32>
    tpu.vector_store %arg6[%c0, %c0_0], %0 {strides = array<i32>} : memref<64x64xf32, #tpu.memory_space<vmem>>, vector<64x64xf32>,
    %c0_1 = arith.constant 0 : index
    %2 = memref.load %arg0[%c0_1] : memref<16xi32, #tpu.memory_space<smem>>
    %3 = arith.index_cast %2 : i32 to index
    %c0_2 = arith.constant 0 : index
    %4 = vector.load %arg1[%3, %c0_2] : memref<100x32xf32, #tpu.memory_space<vmem>>, vector<1x32xf32>
    %c0_3 = arith.constant 0 : index
    %c0_4 = arith.constant 0 : index
    %5 = vector.load %arg6[%c0_3, %c0_4] : memref<64x64xf32, #tpu.memory_space<vmem>>, vector<1x32xf32>
    tpu.vector_store %arg6[%c0_3, %c0_4], %4 {strides = array<i32>} : memref<64x64xf32, #tpu.memory_space<vmem>>, vector<1x32xf32>,
    %c8 = arith.constant 8 : index
    %6 = memref.load %arg0[%c8] : memref<16xi32, #tpu.memory_space<smem>>
    %7 = arith.index_cast %6 : i32 to index
    %c0_5 = arith.constant 0 : index
    %8 = vector.load %arg1[%7, %c0_5] : memref<100x32xf32, #tpu.memory_space<vmem>>, vector<1x32xf32>
    %c1 = arith.constant 1 : index
    %c0_6 = arith.constant 0 : index
    %9 = vector.load %arg6[%c1, %c0_6] : memref<64x64xf32, #tpu.memory_space<vmem>>, vector<1x32xf32>
    tpu.vector_store %arg6[%c1, %c0_6], %8 {strides = array<i32>} : memref<64x64xf32, #tpu.memory_space<vmem>>, vector<1x32xf32>,
    %c1_7 = arith.constant 1 : index
    %10 = memref.load %arg0[%c1_7] : memref<16xi32, #tpu.memory_space<smem>>
    %11 = arith.index_cast %10 : i32 to index
    %c0_8 = arith.constant 0 : index
    %12 = vector.load %arg1[%11, %c0_8] : memref<100x32xf32, #tpu.memory_space<vmem>>, vector<1x32xf32>
    %c8_9 = arith.constant 8 : index
    %c0_10 = arith.constant 0 : index
    %13 = vector.load %arg6[%c8_9, %c0_10] : memref<64x64xf32, #tpu.memory_space<vmem>>, vector<1x32xf32>
    tpu.vector_store %arg6[%c8_9, %c0_10], %12 {strides = array<i32>} : memref<64x64xf32, #tpu.memory_space<vmem>>, vector<1x32xf32>,
    %c9 = arith.constant 9 : index
    %14 = memref.load %arg0[%c9] : memref<16xi32, #tpu.memory_space<smem>>
    %15 = arith.index_cast %14 : i32 to index
    %c0_11 = arith.constant 0 : index
    %16 = vector.load %arg1[%15, %c0_11] : memref<100x32xf32, #tpu.memory_space<vmem>>, vector<1x32xf32>
    %c9_12 = arith.constant 9 : index
    %c0_13 = arith.constant 0 : index
    %17 = vector.load %arg6[%c9_12, %c0_13] : memref<64x64xf32, #tpu.memory_space<vmem>>, vector<1x32xf32>
    tpu.vector_store %arg6[%c9_12, %c0_13], %16 {strides = array<i32>} : memref<64x64xf32, #tpu.memory_space<vmem>>, vector<1x32xf32>,
    %c2 = arith.constant 2 : index
    %18 = memref.load %arg0[%c2] : memref<16xi32, #tpu.memory_space<smem>>
    %19 = arith.index_cast %18 : i32 to index
    %c0_14 = arith.constant 0 : index
    %20 = vector.load %arg1[%19, %c0_14] : memref<100x32xf32, #tpu.memory_space<vmem>>, vector<1x32xf32>
    %c16 = arith.constant 16 : index
    %c0_15 = arith.constant 0 : index
    %21 = vector.load %arg6[%c16, %c0_15] : memref<64x64xf32, #tpu.memory_space<vmem>>, vector<1x32xf32>
    tpu.vector_store %arg6[%c16, %c0_15], %20 {strides = array<i32>} : memref<64x64xf32, #tpu.memory_space<vmem>>, vector<1x32xf32>,
    %c10 = arith.constant 10 : index
    %22 = memref.load %arg0[%c10] : memref<16xi32, #tpu.memory_space<smem>>
    %23 = arith.index_cast %22 : i32 to index
    %c0_16 = arith.constant 0 : index
    %24 = vector.load %arg1[%23, %c0_16] : memref<100x32xf32, #tpu.memory_space<vmem>>, vector<1x32xf32>
    %c17 = arith.constant 17 : index
    %c0_17 = arith.constant 0 : index
    %25 = vector.load %arg6[%c17, %c0_17] : memref<64x64xf32, #tpu.memory_space<vmem>>, vector<1x32xf32>
    tpu.vector_store %arg6[%c17, %c0_17], %24 {strides = array<i32>} : memref<64x64xf32, #tpu.memory_space<vmem>>, vector<1x32xf32>,
    %c3 = arith.constant 3 : index
    %26 = memref.load %arg0[%c3] : memref<16xi32, #tpu.memory_space<smem>>
    %27 = arith.index_cast %26 : i32 to index
    %c0_18 = arith.constant 0 : index
    %28 = vector.load %arg1[%27, %c0_18] : memref<100x32xf32, #tpu.memory_space<vmem>>, vector<1x32xf32>
    %c24 = arith.constant 24 : index
    %c0_19 = arith.constant 0 : index
    %29 = vector.load %arg6[%c24, %c0_19] : memref<64x64xf32, #tpu.memory_space<vmem>>, vector<1x32xf32>
    tpu.vector_store %arg6[%c24, %c0_19], %28 {strides = array<i32>} : memref<64x64xf32, #tpu.memory_space<vmem>>, vector<1x32xf32>,
    %c11 = arith.constant 11 : index
    %30 = memref.load %arg0[%c11] : memref<16xi32, #tpu.memory_space<smem>>
    %31 = arith.index_cast %30 : i32 to index
    %c0_20 = arith.constant 0 : index
    %32 = vector.load %arg1[%31, %c0_20] : memref<100x32xf32, #tpu.memory_space<vmem>>, vector<1x32xf32>
    %c25 = arith.constant 25 : index
    %c0_21 = arith.constant 0 : index
    %33 = vector.load %arg6[%c25, %c0_21] : memref<64x64xf32, #tpu.memory_space<vmem>>, vector<1x32xf32>
    tpu.vector_store %arg6[%c25, %c0_21], %32 {strides = array<i32>} : memref<64x64xf32, #tpu.memory_space<vmem>>, vector<1x32xf32>,
    %c4 = arith.constant 4 : index
    %34 = memref.load %arg0[%c4] : memref<16xi32, #tpu.memory_space<smem>>
    %35 = arith.index_cast %34 : i32 to index
    %c0_22 = arith.constant 0 : index
    %36 = vector.load %arg1[%35, %c0_22] : memref<100x32xf32, #tpu.memory_space<vmem>>, vector<1x32xf32>
    %c32 = arith.constant 32 : index
    %c0_23 = arith.constant 0 : index
    %37 = vector.load %arg6[%c32, %c0_23] : memref<64x64xf32, #tpu.memory_space<vmem>>, vector<1x32xf32>
    tpu.vector_store %arg6[%c32, %c0_23], %36 {strides = array<i32>} : memref<64x64xf32, #tpu.memory_space<vmem>>, vector<1x32xf32>,
    %c12 = arith.constant 12 : index
    %38 = memref.load %arg0[%c12] : memref<16xi32, #tpu.memory_space<smem>>
    %39 = arith.index_cast %38 : i32 to index
    %c0_24 = arith.constant 0 : index
    %40 = vector.load %arg1[%39, %c0_24] : memref<100x32xf32, #tpu.memory_space<vmem>>, vector<1x32xf32>
    %c33 = arith.constant 33 : index
    %c0_25 = arith.constant 0 : index
    %41 = vector.load %arg6[%c33, %c0_25] : memref<64x64xf32, #tpu.memory_space<vmem>>, vector<1x32xf32>
    tpu.vector_store %arg6[%c33, %c0_25], %40 {strides = array<i32>} : memref<64x64xf32, #tpu.memory_space<vmem>>, vector<1x32xf32>,
    %c5 = arith.constant 5 : index
    %42 = memref.load %arg0[%c5] : memref<16xi32, #tpu.memory_space<smem>>
    %43 = arith.index_cast %42 : i32 to index
    %c0_26 = arith.constant 0 : index
    %44 = vector.load %arg1[%43, %c0_26] : memref<100x32xf32, #tpu.memory_space<vmem>>, vector<1x32xf32>
    %c40 = arith.constant 40 : index
    %c0_27 = arith.constant 0 : index
    %45 = vector.load %arg6[%c40, %c0_27] : memref<64x64xf32, #tpu.memory_space<vmem>>, vector<1x32xf32>
    tpu.vector_store %arg6[%c40, %c0_27], %44 {strides = array<i32>} : memref<64x64xf32, #tpu.memory_space<vmem>>, vector<1x32xf32>,
    %c13 = arith.constant 13 : index
    %46 = memref.load %arg0[%c13] : memref<16xi32, #tpu.memory_space<smem>>
    %47 = arith.index_cast %46 : i32 to index
    %c0_28 = arith.constant 0 : index
    %48 = vector.load %arg1[%47, %c0_28] : memref<100x32xf32, #tpu.memory_space<vmem>>, vector<1x32xf32>
    %c41 = arith.constant 41 : index
    %c0_29 = arith.constant 0 : index
    %49 = vector.load %arg6[%c41, %c0_29] : memref<64x64xf32, #tpu.memory_space<vmem>>, vector<1x32xf32>
    tpu.vector_store %arg6[%c41, %c0_29], %48 {strides = array<i32>} : memref<64x64xf32, #tpu.memory_space<vmem>>, vector<1x32xf32>,
    %c6 = arith.constant 6 : index
    %50 = memref.load %arg0[%c6] : memref<16xi32, #tpu.memory_space<smem>>
    %51 = arith.index_cast %50 : i32 to index
    %c0_30 = arith.constant 0 : index
    %52 = vector.load %arg1[%51, %c0_30] : memref<100x32xf32, #tpu.memory_space<vmem>>, vector<1x32xf32>
    %c48 = arith.constant 48 : index
    %c0_31 = arith.constant 0 : index
    %53 = vector.load %arg6[%c48, %c0_31] : memref<64x64xf32, #tpu.memory_space<vmem>>, vector<1x32xf32>
    tpu.vector_store %arg6[%c48, %c0_31], %52 {strides = array<i32>} : memref<64x64xf32, #tpu.memory_space<vmem>>, vector<1x32xf32>,
    %c14 = arith.constant 14 : index
    %54 = memref.load %arg0[%c14] : memref<16xi32, #tpu.memory_space<smem>>
    %55 = arith.index_cast %54 : i32 to index
    %c0_32 = arith.constant 0 : index
    %56 = vector.load %arg1[%55, %c0_32] : memref<100x32xf32, #tpu.memory_space<vmem>>, vector<1x32xf32>
    %c49 = arith.constant 49 : index
    %c0_33 = arith.constant 0 : index
    %57 = vector.load %arg6[%c49, %c0_33] : memref<64x64xf32, #tpu.memory_space<vmem>>, vector<1x32xf32>
    tpu.vector_store %arg6[%c49, %c0_33], %56 {strides = array<i32>} : memref<64x64xf32, #tpu.memory_space<vmem>>, vector<1x32xf32>,
    %c7 = arith.constant 7 : index
    %58 = memref.load %arg0[%c7] : memref<16xi32, #tpu.memory_space<smem>>
    %59 = arith.index_cast %58 : i32 to index
    %c0_34 = arith.constant 0 : index
    %60 = vector.load %arg1[%59, %c0_34] : memref<100x32xf32, #tpu.memory_space<vmem>>, vector<1x32xf32>
    %c56 = arith.constant 56 : index
    %c0_35 = arith.constant 0 : index
    %61 = vector.load %arg6[%c56, %c0_35] : memref<64x64xf32, #tpu.memory_space<vmem>>, vector<1x32xf32>
    tpu.vector_store %arg6[%c56, %c0_35], %60 {strides = array<i32>} : memref<64x64xf32, #tpu.memory_space<vmem>>, vector<1x32xf32>,
    %c15 = arith.constant 15 : index
    %62 = memref.load %arg0[%c15] : memref<16xi32, #tpu.memory_space<smem>>
    %63 = arith.index_cast %62 : i32 to index
    %c0_36 = arith.constant 0 : index
    %64 = vector.load %arg1[%63, %c0_36] : memref<100x32xf32, #tpu.memory_space<vmem>>, vector<1x32xf32>
    %c57 = arith.constant 57 : index
    %c0_37 = arith.constant 0 : index
    %65 = vector.load %arg6[%c57, %c0_37] : memref<64x64xf32, #tpu.memory_space<vmem>>, vector<1x32xf32>
    tpu.vector_store %arg6[%c57, %c0_37], %64 {strides = array<i32>} : memref<64x64xf32, #tpu.memory_space<vmem>>, vector<1x32xf32>,
    %c56_38 = arith.constant 56 : index
    %c0_39 = arith.constant 0 : index
    %66 = vector.load %arg6[%c56_38, %c0_39] : memref<64x64xf32, #tpu.memory_space<vmem>>, vector<8x32xf32>
    %c0_40 = arith.constant 0 : index
    %c32_41 = arith.constant 32 : index
    %67 = vector.load %arg6[%c0_40, %c32_41] : memref<64x64xf32, #tpu.memory_space<vmem>>, vector<8x32xf32>
    tpu.vector_store %arg6[%c0_40, %c32_41], %66 {strides = array<i32>} : memref<64x64xf32, #tpu.memory_space<vmem>>, vector<8x32xf32>,
    %c48_42 = arith.constant 48 : index
    %c0_43 = arith.constant 0 : index
    %68 = vector.load %arg6[%c48_42, %c0_43] : memref<64x64xf32, #tpu.memory_space<vmem>>, vector<8x32xf32>
    %c8_44 = arith.constant 8 : index
    %c32_45 = arith.constant 32 : index
    %69 = vector.load %arg6[%c8_44, %c32_45] : memref<64x64xf32, #tpu.memory_space<vmem>>, vector<8x32xf32>
    tpu.vector_store %arg6[%c8_44, %c32_45], %68 {strides = array<i32>} : memref<64x64xf32, #tpu.memory_space<vmem>>, vector<8x32xf32>,
    %c40_46 = arith.constant 40 : index
    %c0_47 = arith.constant 0 : index
    %70 = vector.load %arg6[%c40_46, %c0_47] : memref<64x64xf32, #tpu.memory_space<vmem>>, vector<8x32xf32>
    %c16_48 = arith.constant 16 : index
    %c32_49 = arith.constant 32 : index
    %71 = vector.load %arg6[%c16_48, %c32_49] : memref<64x64xf32, #tpu.memory_space<vmem>>, vector<8x32xf32>
    tpu.vector_store %arg6[%c16_48, %c32_49], %70 {strides = array<i32>} : memref<64x64xf32, #tpu.memory_space<vmem>>, vector<8x32xf32>,
    %c32_50 = arith.constant 32 : index
    %c0_51 = arith.constant 0 : index
    %72 = vector.load %arg6[%c32_50, %c0_51] : memref<64x64xf32, #tpu.memory_space<vmem>>, vector<8x32xf32>
    %c24_52 = arith.constant 24 : index
    %c32_53 = arith.constant 32 : index
    %73 = vector.load %arg6[%c24_52, %c32_53] : memref<64x64xf32, #tpu.memory_space<vmem>>, vector<8x32xf32>
    tpu.vector_store %arg6[%c24_52, %c32_53], %72 {strides = array<i32>} : memref<64x64xf32, #tpu.memory_space<vmem>>, vector<8x32xf32>,
    %c24_54 = arith.constant 24 : index
    %c0_55 = arith.constant 0 : index
    %74 = vector.load %arg6[%c24_54, %c0_55] : memref<64x64xf32, #tpu.memory_space<vmem>>, vector<8x32xf32>
    %c32_56 = arith.constant 32 : index
    %c32_57 = arith.constant 32 : index
    %75 = vector.load %arg6[%c32_56, %c32_57] : memref<64x64xf32, #tpu.memory_space<vmem>>, vector<8x32xf32>
    tpu.vector_store %arg6[%c32_56, %c32_57], %74 {strides = array<i32>} : memref<64x64xf32, #tpu.memory_space<vmem>>, vector<8x32xf32>,
    %c16_58 = arith.constant 16 : index
    %c0_59 = arith.constant 0 : index
    %76 = vector.load %arg6[%c16_58, %c0_59] : memref<64x64xf32, #tpu.memory_space<vmem>>, vector<8x32xf32>
    %c40_60 = arith.constant 40 : index
    %c32_61 = arith.constant 32 : index
    %77 = vector.load %arg6[%c40_60, %c32_61] : memref<64x64xf32, #tpu.memory_space<vmem>>, vector<8x32xf32>
    tpu.vector_store %arg6[%c40_60, %c32_61], %76 {strides = array<i32>} : memref<64x64xf32, #tpu.memory_space<vmem>>, vector<8x32xf32>,
    %c8_62 = arith.constant 8 : index
    %c0_63 = arith.constant 0 : index
    %78 = vector.load %arg6[%c8_62, %c0_63] : memref<64x64xf32, #tpu.memory_space<vmem>>, vector<8x32xf32>
    %c48_64 = arith.constant 48 : index
    %c32_65 = arith.constant 32 : index
    %79 = vector.load %arg6[%c48_64, %c32_65] : memref<64x64xf32, #tpu.memory_space<vmem>>, vector<8x32xf32>
    tpu.vector_store %arg6[%c48_64, %c32_65], %78 {strides = array<i32>} : memref<64x64xf32, #tpu.memory_space<vmem>>, vector<8x32xf32>,
    %c0_66 = arith.constant 0 : index
    %c0_67 = arith.constant 0 : index
    %80 = vector.load %arg6[%c0_66, %c0_67] : memref<64x64xf32, #tpu.memory_space<vmem>>, vector<8x32xf32>
    %c56_68 = arith.constant 56 : index
    %c32_69 = arith.constant 32 : index
    %81 = vector.load %arg6[%c56_68, %c32_69] : memref<64x64xf32, #tpu.memory_space<vmem>>, vector<8x32xf32>
    tpu.vector_store %arg6[%c56_68, %c32_69], %80 {strides = array<i32>} : memref<64x64xf32, #tpu.memory_space<vmem>>, vector<8x32xf32>,
    %c0_70 = arith.constant 0 : index
    %c0_71 = arith.constant 0 : index
    %82 = vector.load %arg2[%c0_70, %c0_71] : memref<192x256xf32, #tpu.memory_space<vmem>>, vector<64x256xf32>
    %c64 = arith.constant 64 : index
    %c0_72 = arith.constant 0 : index
    %83 = vector.load %arg2[%c64, %c0_72] : memref<192x256xf32, #tpu.memory_space<vmem>>, vector<128x256xf32>
    %c0_73 = arith.constant 0 : index
    %c0_74 = arith.constant 0 : index
    %84 = vector.load %arg4[%c0_73, %c0_74] : memref<8x256xf32, #tpu.memory_space<vmem>>, vector<1x256xf32>
    %c0_75 = arith.constant 0 : index
    %c0_76 = arith.constant 0 : index
    %85 = vector.load %arg6[%c0_75, %c0_76] : memref<64x64xf32, #tpu.memory_space<vmem>>, vector<64x64xf32>
    %cst_77 = arith.constant dense<0.000000e+00> : vector<64x256xf32>
    %86 = tpu.matmul %85, %82, %cst_77 {dimension_numbers = #tpu.dot_dimension_numbers<[1], [0], [0], [1], [0, 0, 1, 1], [], []>} : vector<64x64xf32>, vector<64x256xf32>, vector<64x256xf32> -> vector<64x256xf32>
    %87 = vector.broadcast %84 : vector<1x256xf32> to vector<64x256xf32>
    %88 = arith.addf %86, %87 : vector<64x256xf32>
    %c1_78 = arith.constant 1 : index
    %c0_79 = arith.constant 0 : index
    %89 = vector.load %arg4[%c1_78, %c0_79] : memref<8x256xf32, #tpu.memory_space<vmem>>, vector<1x128xf32>
    %90 = vector.shape_cast %89 : vector<1x128xf32> to vector<1x128xf32>
    %91 = vector.broadcast %90 : vector<1x128xf32> to vector<8x128xf32>
    %cst_80 = arith.constant 0.000000e+00 : f32
    %92 = vector.broadcast %cst_80 : f32 to vector<8x128xf32>
    %93 = vector.extract_strided_slice %88 {offsets = [0, 0], sizes = [8, 256], strides = [1, 1]} : vector<64x256xf32> to vector<8x256xf32>
    %cst_81 = arith.constant dense<0.000000e+00> : vector<8x256xf32>
    %94 = tpu.matmul %92, %83, %cst_81 {dimension_numbers = #tpu.dot_dimension_numbers<[1], [0], [0], [1], [0, 0, 1, 1], [], []>} : vector<8x128xf32>, vector<128x256xf32>, vector<8x256xf32> -> vector<8x256xf32>
    %95 = vector.extract_strided_slice %93 {offsets = [0, 0], sizes = [8, 128], strides = [1, 1]} : vector<8x256xf32> to vector<8x128xf32>
    %96 = vector.extract_strided_slice %94 {offsets = [0, 0], sizes = [8, 128], strides = [1, 1]} : vector<8x256xf32> to vector<8x128xf32>
    %97 = arith.addf %95, %96 : vector<8x128xf32>
    %98 = arith.negf %97 : vector<8x128xf32>
    %99 = math.exp %98 : vector<8x128xf32>
    %cst_82 = arith.constant 1.000000e+00 : f32
    %100 = vector.broadcast %cst_82 : f32 to vector<8x128xf32>
    %101 = arith.addf %100, %99 : vector<8x128xf32>
    %102 = arith.divf %100, %101 : vector<8x128xf32>
    %103 = vector.extract_strided_slice %93 {offsets = [0, 128], sizes = [8, 128], strides = [1, 1]} : vector<8x256xf32> to vector<8x128xf32>
    %104 = vector.extract_strided_slice %94 {offsets = [0, 128], sizes = [8, 128], strides = [1, 1]} : vector<8x256xf32> to vector<8x128xf32>
    %105 = arith.addf %104, %91 : vector<8x128xf32>
    %106 = arith.mulf %102, %105 : vector<8x128xf32>
    %107 = arith.addf %103, %106 : vector<8x128xf32>
    %108 = math.tanh %107 : vector<8x128xf32>
    %c64_i32 = arith.constant 64 : i32
    %109 = tpu.dynamic_rotate %102 by %c64_i32 dim 1 : vector<8x128xf32>, i32 -> vector<8x128xf32>
    %cst_83 = arith.constant 1.000000e+00 : f32
    %110 = vector.broadcast %cst_83 : f32 to vector<8x128xf32>
    %111 = arith.subf %110, %109 : vector<8x128xf32>
    %112 = arith.mulf %111, %108 : vector<8x128xf32>
    %113 = arith.mulf %109, %92 : vector<8x128xf32>
    %114 = arith.addf %112, %113 : vector<8x128xf32>
    %115 = vector.extract_strided_slice %88 {offsets = [8, 0], sizes = [8, 256], strides = [1, 1]} : vector<64x256xf32> to vector<8x256xf32>
    %cst_84 = arith.constant dense<0.000000e+00> : vector<8x256xf32>
    %116 = tpu.matmul %114, %83, %cst_84 {dimension_numbers = #tpu.dot_dimension_numbers<[1], [0], [0], [1], [0, 0, 1, 1], [], []>} : vector<8x128xf32>, vector<128x256xf32>, vector<8x256xf32> -> vector<8x256xf32>
    %117 = vector.extract_strided_slice %115 {offsets = [0, 0], sizes = [8, 128], strides = [1, 1]} : vector<8x256xf32> to vector<8x128xf32>
    %118 = vector.extract_strided_slice %116 {offsets = [0, 0], sizes = [8, 128], strides = [1, 1]} : vector<8x256xf32> to vector<8x128xf32>
    %119 = arith.addf %117, %118 : vector<8x128xf32>
    %120 = arith.negf %119 : vector<8x128xf32>
    %121 = math.exp %120 : vector<8x128xf32>
    %cst_85 = arith.constant 1.000000e+00 : f32
    %122 = vector.broadcast %cst_85 : f32 to vector<8x128xf32>
    %123 = arith.addf %122, %121 : vector<8x128xf32>
    %124 = arith.divf %122, %123 : vector<8x128xf32>
    %125 = vector.extract_strided_slice %115 {offsets = [0, 128], sizes = [8, 128], strides = [1, 1]} : vector<8x256xf32> to vector<8x128xf32>
    %126 = vector.extract_strided_slice %116 {offsets = [0, 128], sizes = [8, 128], strides = [1, 1]} : vector<8x256xf32> to vector<8x128xf32>
    %127 = arith.addf %126, %91 : vector<8x128xf32>
    %128 = arith.mulf %124, %127 : vector<8x128xf32>
    %129 = arith.addf %125, %128 : vector<8x128xf32>
    %130 = math.tanh %129 : vector<8x128xf32>
    %c64_i32_86 = arith.constant 64 : i32
    %131 = tpu.dynamic_rotate %124 by %c64_i32_86 dim 1 : vector<8x128xf32>, i32 -> vector<8x128xf32>
    %cst_87 = arith.constant 1.000000e+00 : f32
    %132 = vector.broadcast %cst_87 : f32 to vector<8x128xf32>
    %133 = arith.subf %132, %131 : vector<8x128xf32>
    %134 = arith.mulf %133, %130 : vector<8x128xf32>
    %135 = arith.mulf %131, %114 : vector<8x128xf32>
    %136 = arith.addf %134, %135 : vector<8x128xf32>
    %137 = vector.extract_strided_slice %88 {offsets = [16, 0], sizes = [8, 256], strides = [1, 1]} : vector<64x256xf32> to vector<8x256xf32>
    %cst_88 = arith.constant dense<0.000000e+00> : vector<8x256xf32>
    %138 = tpu.matmul %136, %83, %cst_88 {dimension_numbers = #tpu.dot_dimension_numbers<[1], [0], [0], [1], [0, 0, 1, 1], [], []>} : vector<8x128xf32>, vector<128x256xf32>, vector<8x256xf32> -> vector<8x256xf32>
    %139 = vector.extract_strided_slice %137 {offsets = [0, 0], sizes = [8, 128], strides = [1, 1]} : vector<8x256xf32> to vector<8x128xf32>
    %140 = vector.extract_strided_slice %138 {offsets = [0, 0], sizes = [8, 128], strides = [1, 1]} : vector<8x256xf32> to vector<8x128xf32>
    %141 = arith.addf %139, %140 : vector<8x128xf32>
    %142 = arith.negf %141 : vector<8x128xf32>
    %143 = math.exp %142 : vector<8x128xf32>
    %cst_89 = arith.constant 1.000000e+00 : f32
    %144 = vector.broadcast %cst_89 : f32 to vector<8x128xf32>
    %145 = arith.addf %144, %143 : vector<8x128xf32>
    %146 = arith.divf %144, %145 : vector<8x128xf32>
    %147 = vector.extract_strided_slice %137 {offsets = [0, 128], sizes = [8, 128], strides = [1, 1]} : vector<8x256xf32> to vector<8x128xf32>
    %148 = vector.extract_strided_slice %138 {offsets = [0, 128], sizes = [8, 128], strides = [1, 1]} : vector<8x256xf32> to vector<8x128xf32>
    %149 = arith.addf %148, %91 : vector<8x128xf32>
    %150 = arith.mulf %146, %149 : vector<8x128xf32>
    %151 = arith.addf %147, %150 : vector<8x128xf32>
    %152 = math.tanh %151 : vector<8x128xf32>
    %c64_i32_90 = arith.constant 64 : i32
    %153 = tpu.dynamic_rotate %146 by %c64_i32_90 dim 1 : vector<8x128xf32>, i32 -> vector<8x128xf32>
    %cst_91 = arith.constant 1.000000e+00 : f32
    %154 = vector.broadcast %cst_91 : f32 to vector<8x128xf32>
    %155 = arith.subf %154, %153 : vector<8x128xf32>
    %156 = arith.mulf %155, %152 : vector<8x128xf32>
    %157 = arith.mulf %153, %136 : vector<8x128xf32>
    %158 = arith.addf %156, %157 : vector<8x128xf32>
    %159 = vector.extract_strided_slice %88 {offsets = [24, 0], sizes = [8, 256], strides = [1, 1]} : vector<64x256xf32> to vector<8x256xf32>
    %cst_92 = arith.constant dense<0.000000e+00> : vector<8x256xf32>
    %160 = tpu.matmul %158, %83, %cst_92 {dimension_numbers = #tpu.dot_dimension_numbers<[1], [0], [0], [1], [0, 0, 1, 1], [], []>} : vector<8x128xf32>, vector<128x256xf32>, vector<8x256xf32> -> vector<8x256xf32>
    %161 = vector.extract_strided_slice %159 {offsets = [0, 0], sizes = [8, 128], strides = [1, 1]} : vector<8x256xf32> to vector<8x128xf32>
    %162 = vector.extract_strided_slice %160 {offsets = [0, 0], sizes = [8, 128], strides = [1, 1]} : vector<8x256xf32> to vector<8x128xf32>
    %163 = arith.addf %161, %162 : vector<8x128xf32>
    %164 = arith.negf %163 : vector<8x128xf32>
    %165 = math.exp %164 : vector<8x128xf32>
    %cst_93 = arith.constant 1.000000e+00 : f32
    %166 = vector.broadcast %cst_93 : f32 to vector<8x128xf32>
    %167 = arith.addf %166, %165 : vector<8x128xf32>
    %168 = arith.divf %166, %167 : vector<8x128xf32>
    %169 = vector.extract_strided_slice %159 {offsets = [0, 128], sizes = [8, 128], strides = [1, 1]} : vector<8x256xf32> to vector<8x128xf32>
    %170 = vector.extract_strided_slice %160 {offsets = [0, 128], sizes = [8, 128], strides = [1, 1]} : vector<8x256xf32> to vector<8x128xf32>
    %171 = arith.addf %170, %91 : vector<8x128xf32>
    %172 = arith.mulf %168, %171 : vector<8x128xf32>
    %173 = arith.addf %169, %172 : vector<8x128xf32>
    %174 = math.tanh %173 : vector<8x128xf32>
    %c64_i32_94 = arith.constant 64 : i32
    %175 = tpu.dynamic_rotate %168 by %c64_i32_94 dim 1 : vector<8x128xf32>, i32 -> vector<8x128xf32>
    %cst_95 = arith.constant 1.000000e+00 : f32
    %176 = vector.broadcast %cst_95 : f32 to vector<8x128xf32>
    %177 = arith.subf %176, %175 : vector<8x128xf32>
    %178 = arith.mulf %177, %174 : vector<8x128xf32>
    %179 = arith.mulf %175, %158 : vector<8x128xf32>
    %180 = arith.addf %178, %179 : vector<8x128xf32>
    %181 = vector.extract_strided_slice %88 {offsets = [32, 0], sizes = [8, 256], strides = [1, 1]} : vector<64x256xf32> to vector<8x256xf32>
    %cst_96 = arith.constant dense<0.000000e+00> : vector<8x256xf32>
    %182 = tpu.matmul %180, %83, %cst_96 {dimension_numbers = #tpu.dot_dimension_numbers<[1], [0], [0], [1], [0, 0, 1, 1], [], []>} : vector<8x128xf32>, vector<128x256xf32>, vector<8x256xf32> -> vector<8x256xf32>
    %183 = vector.extract_strided_slice %181 {offsets = [0, 0], sizes = [8, 128], strides = [1, 1]} : vector<8x256xf32> to vector<8x128xf32>
    %184 = vector.extract_strided_slice %182 {offsets = [0, 0], sizes = [8, 128], strides = [1, 1]} : vector<8x256xf32> to vector<8x128xf32>
    %185 = arith.addf %183, %184 : vector<8x128xf32>
    %186 = arith.negf %185 : vector<8x128xf32>
    %187 = math.exp %186 : vector<8x128xf32>
    %cst_97 = arith.constant 1.000000e+00 : f32
    %188 = vector.broadcast %cst_97 : f32 to vector<8x128xf32>
    %189 = arith.addf %188, %187 : vector<8x128xf32>
    %190 = arith.divf %188, %189 : vector<8x128xf32>
    %191 = vector.extract_strided_slice %181 {offsets = [0, 128], sizes = [8, 128], strides = [1, 1]} : vector<8x256xf32> to vector<8x128xf32>
    %192 = vector.extract_strided_slice %182 {offsets = [0, 128], sizes = [8, 128], strides = [1, 1]} : vector<8x256xf32> to vector<8x128xf32>
    %193 = arith.addf %192, %91 : vector<8x128xf32>
    %194 = arith.mulf %190, %193 : vector<8x128xf32>
    %195 = arith.addf %191, %194 : vector<8x128xf32>
    %196 = math.tanh %195 : vector<8x128xf32>
    %c64_i32_98 = arith.constant 64 : i32
    %197 = tpu.dynamic_rotate %190 by %c64_i32_98 dim 1 : vector<8x128xf32>, i32 -> vector<8x128xf32>
    %cst_99 = arith.constant 1.000000e+00 : f32
    %198 = vector.broadcast %cst_99 : f32 to vector<8x128xf32>
    %199 = arith.subf %198, %197 : vector<8x128xf32>
    %200 = arith.mulf %199, %196 : vector<8x128xf32>
    %201 = arith.mulf %197, %180 : vector<8x128xf32>
    %202 = arith.addf %200, %201 : vector<8x128xf32>
    %203 = vector.extract_strided_slice %88 {offsets = [40, 0], sizes = [8, 256], strides = [1, 1]} : vector<64x256xf32> to vector<8x256xf32>
    %cst_100 = arith.constant dense<0.000000e+00> : vector<8x256xf32>
    %204 = tpu.matmul %202, %83, %cst_100 {dimension_numbers = #tpu.dot_dimension_numbers<[1], [0], [0], [1], [0, 0, 1, 1], [], []>} : vector<8x128xf32>, vector<128x256xf32>, vector<8x256xf32> -> vector<8x256xf32>
    %205 = vector.extract_strided_slice %203 {offsets = [0, 0], sizes = [8, 128], strides = [1, 1]} : vector<8x256xf32> to vector<8x128xf32>
    %206 = vector.extract_strided_slice %204 {offsets = [0, 0], sizes = [8, 128], strides = [1, 1]} : vector<8x256xf32> to vector<8x128xf32>
    %207 = arith.addf %205, %206 : vector<8x128xf32>
    %208 = arith.negf %207 : vector<8x128xf32>
    %209 = math.exp %208 : vector<8x128xf32>
    %cst_101 = arith.constant 1.000000e+00 : f32
    %210 = vector.broadcast %cst_101 : f32 to vector<8x128xf32>
    %211 = arith.addf %210, %209 : vector<8x128xf32>
    %212 = arith.divf %210, %211 : vector<8x128xf32>
    %213 = vector.extract_strided_slice %203 {offsets = [0, 128], sizes = [8, 128], strides = [1, 1]} : vector<8x256xf32> to vector<8x128xf32>
    %214 = vector.extract_strided_slice %204 {offsets = [0, 128], sizes = [8, 128], strides = [1, 1]} : vector<8x256xf32> to vector<8x128xf32>
    %215 = arith.addf %214, %91 : vector<8x128xf32>
    %216 = arith.mulf %212, %215 : vector<8x128xf32>
    %217 = arith.addf %213, %216 : vector<8x128xf32>
    %218 = math.tanh %217 : vector<8x128xf32>
    %c64_i32_102 = arith.constant 64 : i32
    %219 = tpu.dynamic_rotate %212 by %c64_i32_102 dim 1 : vector<8x128xf32>, i32 -> vector<8x128xf32>
    %cst_103 = arith.constant 1.000000e+00 : f32
    %220 = vector.broadcast %cst_103 : f32 to vector<8x128xf32>
    %221 = arith.subf %220, %219 : vector<8x128xf32>
    %222 = arith.mulf %221, %218 : vector<8x128xf32>
    %223 = arith.mulf %219, %202 : vector<8x128xf32>
    %224 = arith.addf %222, %223 : vector<8x128xf32>
    %225 = vector.extract_strided_slice %88 {offsets = [48, 0], sizes = [8, 256], strides = [1, 1]} : vector<64x256xf32> to vector<8x256xf32>
    %cst_104 = arith.constant dense<0.000000e+00> : vector<8x256xf32>
    %226 = tpu.matmul %224, %83, %cst_104 {dimension_numbers = #tpu.dot_dimension_numbers<[1], [0], [0], [1], [0, 0, 1, 1], [], []>} : vector<8x128xf32>, vector<128x256xf32>, vector<8x256xf32> -> vector<8x256xf32>
    %227 = vector.extract_strided_slice %225 {offsets = [0, 0], sizes = [8, 128], strides = [1, 1]} : vector<8x256xf32> to vector<8x128xf32>
    %228 = vector.extract_strided_slice %226 {offsets = [0, 0], sizes = [8, 128], strides = [1, 1]} : vector<8x256xf32> to vector<8x128xf32>
    %229 = arith.addf %227, %228 : vector<8x128xf32>
    %230 = arith.negf %229 : vector<8x128xf32>
    %231 = math.exp %230 : vector<8x128xf32>
    %cst_105 = arith.constant 1.000000e+00 : f32
    %232 = vector.broadcast %cst_105 : f32 to vector<8x128xf32>
    %233 = arith.addf %232, %231 : vector<8x128xf32>
    %234 = arith.divf %232, %233 : vector<8x128xf32>
    %235 = vector.extract_strided_slice %225 {offsets = [0, 128], sizes = [8, 128], strides = [1, 1]} : vector<8x256xf32> to vector<8x128xf32>
    %236 = vector.extract_strided_slice %226 {offsets = [0, 128], sizes = [8, 128], strides = [1, 1]} : vector<8x256xf32> to vector<8x128xf32>
    %237 = arith.addf %236, %91 : vector<8x128xf32>
    %238 = arith.mulf %234, %237 : vector<8x128xf32>
    %239 = arith.addf %235, %238 : vector<8x128xf32>
    %240 = math.tanh %239 : vector<8x128xf32>
    %c64_i32_106 = arith.constant 64 : i32
    %241 = tpu.dynamic_rotate %234 by %c64_i32_106 dim 1 : vector<8x128xf32>, i32 -> vector<8x128xf32>
    %cst_107 = arith.constant 1.000000e+00 : f32
    %242 = vector.broadcast %cst_107 : f32 to vector<8x128xf32>
    %243 = arith.subf %242, %241 : vector<8x128xf32>
    %244 = arith.mulf %243, %240 : vector<8x128xf32>
    %245 = arith.mulf %241, %224 : vector<8x128xf32>
    %246 = arith.addf %244, %245 : vector<8x128xf32>
    %247 = vector.extract_strided_slice %88 {offsets = [56, 0], sizes = [8, 256], strides = [1, 1]} : vector<64x256xf32> to vector<8x256xf32>
    %cst_108 = arith.constant dense<0.000000e+00> : vector<8x256xf32>
    %248 = tpu.matmul %246, %83, %cst_108 {dimension_numbers = #tpu.dot_dimension_numbers<[1], [0], [0], [1], [0, 0, 1, 1], [], []>} : vector<8x128xf32>, vector<128x256xf32>, vector<8x256xf32> -> vector<8x256xf32>
    %249 = vector.extract_strided_slice %247 {offsets = [0, 0], sizes = [8, 128], strides = [1, 1]} : vector<8x256xf32> to vector<8x128xf32>
    %250 = vector.extract_strided_slice %248 {offsets = [0, 0], sizes = [8, 128], strides = [1, 1]} : vector<8x256xf32> to vector<8x128xf32>
    %251 = arith.addf %249, %250 : vector<8x128xf32>
    %252 = arith.negf %251 : vector<8x128xf32>
    %253 = math.exp %252 : vector<8x128xf32>
    %cst_109 = arith.constant 1.000000e+00 : f32
    %254 = vector.broadcast %cst_109 : f32 to vector<8x128xf32>
    %255 = arith.addf %254, %253 : vector<8x128xf32>
    %256 = arith.divf %254, %255 : vector<8x128xf32>
    %257 = vector.extract_strided_slice %247 {offsets = [0, 128], sizes = [8, 128], strides = [1, 1]} : vector<8x256xf32> to vector<8x128xf32>
    %258 = vector.extract_strided_slice %248 {offsets = [0, 128], sizes = [8, 128], strides = [1, 1]} : vector<8x256xf32> to vector<8x128xf32>
    %259 = arith.addf %258, %91 : vector<8x128xf32>
    %260 = arith.mulf %256, %259 : vector<8x128xf32>
    %261 = arith.addf %257, %260 : vector<8x128xf32>
    %262 = math.tanh %261 : vector<8x128xf32>
    %c64_i32_110 = arith.constant 64 : i32
    %263 = tpu.dynamic_rotate %256 by %c64_i32_110 dim 1 : vector<8x128xf32>, i32 -> vector<8x128xf32>
    %cst_111 = arith.constant 1.000000e+00 : f32
    %264 = vector.broadcast %cst_111 : f32 to vector<8x128xf32>
    %265 = arith.subf %264, %263 : vector<8x128xf32>
    %266 = arith.mulf %265, %262 : vector<8x128xf32>
    %267 = arith.mulf %263, %246 : vector<8x128xf32>
    %268 = arith.addf %266, %267 : vector<8x128xf32>
    %c2_112 = arith.constant 2 : index
    %c0_113 = arith.constant 0 : index
    %269 = vector.load %arg4[%c2_112, %c0_113] : memref<8x256xf32, #tpu.memory_space<vmem>>, vector<1x2xf32>
    %c0_114 = arith.constant 0 : index
    %c0_115 = arith.constant 0 : index
    %270 = vector.load %arg3[%c0_114, %c0_115] : memref<128x2xf32, #tpu.memory_space<vmem>>, vector<128x2xf32>
    %cst_116 = arith.constant dense<0.000000e+00> : vector<8x2xf32>
    %271 = tpu.matmul %268, %270, %cst_116 {dimension_numbers = #tpu.dot_dimension_numbers<[1], [0], [0], [1], [0, 0, 1, 1], [], []>} : vector<8x128xf32>, vector<128x2xf32>, vector<8x2xf32> -> vector<8x2xf32>
    %272 = vector.broadcast %269 : vector<1x2xf32> to vector<8x2xf32>
    %273 = arith.addf %271, %272 : vector<8x2xf32>
    %cst_117 = arith.constant dense<0xFF800000> : vector<8xf32>
    %274 = vector.multi_reduction <maximumf>, %273, %cst_117 [1] : vector<8x2xf32> to vector<8xf32>
    %275 = vector.shape_cast %274 : vector<8xf32> to vector<8x1xf32>
    %276 = vector.broadcast %275 : vector<8x1xf32> to vector<8x2xf32>
    %277 = arith.subf %273, %276 : vector<8x2xf32>
    %278 = math.exp %277 : vector<8x2xf32>
    %cst_118 = arith.constant dense<0.000000e+00> : vector<8xf32>
    %279 = vector.multi_reduction <add>, %278, %cst_118 [1] : vector<8x2xf32> to vector<8xf32>
    %280 = vector.shape_cast %279 : vector<8xf32> to vector<8x1xf32>
    %281 = math.log %280 : vector<8x1xf32>
    %282 = arith.addf %275, %281 : vector<8x1xf32>
    %283 = vector.broadcast %282 : vector<8x1xf32> to vector<8x2xf32>
    %284 = arith.subf %273, %283 : vector<8x2xf32>
    %285 = vector.extract_strided_slice %284 {offsets = [0, 0], sizes = [2, 2], strides = [1, 1]} : vector<8x2xf32> to vector<2x2xf32>
    %c0_119 = arith.constant 0 : index
    %c0_120 = arith.constant 0 : index
    %286 = vector.load %arg5[%c0_119, %c0_120] : memref<2x2xf32, #tpu.memory_space<vmem>>, vector<2x2xf32>
    tpu.vector_store %arg5[%c0_119, %c0_120], %285 {strides = array<i32>} : memref<2x2xf32, #tpu.memory_space<vmem>>, vector<2x2xf32>,
    return
  }
}

</mosaic_0001>

<bundles_post_ra>
// kernel: gru_forward.1
= control target key start
LH: loop header
LB: loop body
LE: loop exit
PB: predicated region body
PF: predicated region fallthrough
CT: control target
= control target key end

     0   :  { %s1167_s21 = smov [#allocation4]   ;;  %s1802_s0 = inlined_call_operand.vmem [shape: s32[16], index: 0, kind: input, shape index: {}]   ;;  %s1803_s1 = inlined_call_operand.vmem [shape: f32[100,32], index: 1, kind: input, shape index: {}]   ;;  %s1804_s2 = inlined_call_operand.hbm [shape: f32[192,256], index: 2, kind: input, shape index: {}]   ;;  %s1805_s3 = inlined_call_operand.vmem [shape: f32[128,2], index: 3, kind: input, shape index: {}]   ;;  %s1806_s4 = inlined_call_operand.vmem [shape: f32[8,256], index: 4, kind: input, shape index: {}]   ;;  %s1807_s5 = inlined_call_operand.hbm [shape: f32[2,2], index: 5, kind: output, shape index: {}]  }
   0x1   :  { %s11_s20 = sshll.u32 %s1802_s0, 4  ;;  %s12_s20 = int_to_ptr.vmem [resolvable:$true] %s11_s20 }
   0x2   :  { %14 = dma.vmem_to_smem %s12_s20, 16, %s1167_s21, [#allocation3] }
   0x3   :  { %1161 = dma.done.wait [#allocation3], 16 }
   0x4   :  { %1162 = vsyncadd [#allocation3], 4294967280 }
   0x5   :  { %17 = sfence }
   0x6   :  { %18 = vsyncpa [#allocation6], 0 }
   0x7   :  { %19 = vsyncpa [#allocation7], 0  ;;  %s26_s24 = sshll.u32 %s1804_s2, 4  ;;  %s1168_s25 = smov [#allocation5]   ;;  %s27_s24 = int_to_ptr.hbm [resolvable:$true] %s26_s24 }
   0x8   :  { %s28_s26 = sshll.u32 %s1168_s25, 4  ;;  %s1169_s27 = smov 256   ;;  %s29_s26 = int_to_ptr.vmem [resolvable:$true] %s28_s26 }
   0x9   :  { %s1170_s28 = smov 16  }
   0xa   :  { %34 = dma.hbm_to_vmem [thread:$0]  %s27_s24, 6144, %s29_s26, [#allocation6], %s1169_s27, %s1169_s27, %s1170_s28  }
   0xb   :  { %1163 = dma.done.wait [#allocation6], 6144  }
   0xc   :  { %1164 = vsyncadd [#allocation6], 4294961152  ;;  %vm43_vm0 = vcmask 523264   ;;  %v1171_v0 = vmov 0.0   ;;  %s992_s0 = sld [smem:[#allocation4 + $0x6]]  ;;  %vm55_vm1 = vcmask 253952  }
   0xd   :  { %50 = vst.msk [vmem:[#allocation2 + $0x30] sm:$0xff] %vm43_vm0, %v1171_v0  ;;  %s993_s29 = sld [smem:[#allocation4 + $0xe]]  ;;  %v1228_v1 = vld [vmem:[#allocation5 + $0x170] sm:$0xff]  ;;  %v1230_v2 = vld [vmem:[#allocation5 + $0x160] sm:$0xff]  ;;  %s1172_s26 = smov 32   ;;  %v1305_v31 = vld [vmem:[#allocation5 + $0x178] sm:$0xff] }
   0xe   :  { %44 = vst.msk [vmem:[#allocation2] sm:$0xff] %vm43_vm0, %v1171_v0  ;;  %s994_s2 = sld [smem:[#allocation4 + $0x7]]  ;;  %335 = vmatpush.msra.mxu2 %v1228_v1  ;;  %v1242_v5 = vld [vmem:[#allocation5 + $0x150] sm:$0xff]  ;;  %v1250_v8 = vld [vmem:[#allocation5 + $0x140] sm:$0xff]  ;;  %v1310_v34 = vld [vmem:[#allocation5 + $0x168] sm:$0xff]  ;;  %355 = vmatpush.msra.mxu3 %v1305_v31  ;;  %vm122_vm2 = vcmask 523520  }
   0xf   :  { %45 = vst.msk [vmem:[#allocation2 + $0x8] sm:$0xff] %vm43_vm0, %v1171_v0  ;;  %s995_s30 = sld [smem:[#allocation4 + $0xf]]  ;;  %v1260_v10 = vld [vmem:[#allocation5 + $0x130] sm:$0xff]  ;;  %v1265_v12 = vld [vmem:[#allocation5 + $0x120] sm:$0xff]  ;;  %v1314_v36 = vld [vmem:[#allocation5 + $0x158] sm:$0xff] }
  0x10   :  { %46 = vst.msk [vmem:[#allocation2 + $0x10] sm:$0xff] %vm43_vm0, %v1171_v0  ;;  %s982_s6 = sld [smem:[#allocation4 + $0x1]]  ;;  %336 = vmatpush.msra.mxu2 %v1230_v2  ;;  %v1268_v14 = vld [vmem:[#allocation5 + $0x110] sm:$0xff]  ;;  %v1272_v15 = vld [vmem:[#allocation5 + $0x100] sm:$0xff]  ;;  %356 = vmatpush.msra.mxu3 %v1310_v34  ;;  %v1318_v38 = vld [vmem:[#allocation5 + $0x148] sm:$0xff] }
  0x11   :  { %47 = vst.msk [vmem:[#allocation2 + $0x18] sm:$0xff] %vm43_vm0, %v1171_v0  ;;  %s983_s7 = sld [smem:[#allocation4 + $0x9]]  ;;  %v1275_v16 = vld [vmem:[#allocation5 + $0xf0] sm:$0xff]  ;;  %v1278_v18 = vld [vmem:[#allocation5 + $0xe0] sm:$0xff]  ;;  %v1323_v39 = vld [vmem:[#allocation5 + $0x138] sm:$0xff] }
  0x12   :  { %48 = vst.msk [vmem:[#allocation2 + $0x20] sm:$0xff] %vm43_vm0, %v1171_v0  ;;  %s102_s10 = scalar_lea.vmem %s1803_s1, %s992_s0  ;;  %337 = vmatpush.msra.mxu2 %v1242_v5  ;;  %s52_s27 = sld [smem:[#allocation4]]  ;;  %v180_v19 = vld [vmem:[#allocation5 + $0x70] sm:$0xff]  ;;  %v178_v21 = vld [vmem:[#allocation5 + $0x60] sm:$0xff]  ;;  %357 = vmatpush.msra.mxu3 %v1314_v36  ;;  %v1326_v40 = vld [vmem:[#allocation5 + $0x128] sm:$0xff] }
  0x13   :  { %49 = vst.msk [vmem:[#allocation2 + $0x28] sm:$0xff] %vm43_vm0, %v1171_v0  ;;  %v103_v3 = vld [vmem:[%s102_s10] sm:$0x1]  ;;  %s106_s13 = scalar_lea.vmem %s1803_s1, %s993_s29  ;;  %s981_s28 = sld [smem:[#allocation4 + $0x8]]  ;;  %v1286_v20 = vld [vmem:[#allocation5 + $0xd0] sm:$0xff]  ;;  %260 = vmatpush.msra.mxu0 %v180_v19  ;;  %1020 = vmatpush.msra.mxu1 %v180_v19  ;;  %v1331_v41 = vld [vmem:[#allocation5 + $0x118] sm:$0xff] }
  0x14   :  { %51 = vst.msk [vmem:[#allocation2 + $0x38] sm:$0xff] %vm43_vm0, %v1171_v0  ;;  %v107_v4 = vld [vmem:[%s106_s13] sm:$0x1]  ;;  %s110_s16 = scalar_lea.vmem %s1803_s1, %s994_s2  ;;  %338 = vmatpush.msra.mxu2 %v1250_v8  ;;  %v176_v23 = vld [vmem:[#allocation5 + $0x50] sm:$0xff]  ;;  %358 = vmatpush.msra.mxu3 %v1318_v38  ;;  %v1336_v42 = vld [vmem:[#allocation5 + $0x108] sm:$0xff]  ;;  %s988_s8 = sld [smem:[#allocation4 + $0x4]] }
  0x15   :  { %104 = vst.msk [vmem:[#allocation2 + $0x30] sm:$0x1] %vm55_vm1, %v103_v3  ;;  %v111_v6 = vld [vmem:[%s110_s16] sm:$0x1]  ;;  %s114_s19 = scalar_lea.vmem %s1803_s1, %s995_s30  ;;  %v1294_v24 = vld [vmem:[#allocation5 + $0xb0] sm:$0xff]  ;;  %261 = vmatpush.msra.mxu0 %v178_v21  ;;  %1021 = vmatpush.msra.mxu1 %v178_v21  ;;  %v1343_v43 = vld [vmem:[#allocation5 + $0xf8] sm:$0xff] }
  0x16   :  { %108 = vst.msk [vmem:[#allocation2 + $0x31] sm:$0x1] %vm55_vm1, %v107_v4  ;;  %v115_v7 = vld [vmem:[%s114_s19] sm:$0x1]  ;;  %s62_s22 = scalar_lea.vmem %s1803_s1, %s982_s6  ;;  %339 = vmatpush.msra.mxu2 %v1260_v10  ;;  %v172_v29 = vld [vmem:[#allocation5 + $0x30] sm:$0xff]  ;;  %359 = vmatpush.msra.mxu3 %v1323_v39  ;;  %v1346_v44 = vld [vmem:[#allocation5 + $0xe8] sm:$0xff] }
  0x17   :  { %112 = vst.msk [vmem:[#allocation2 + $0x38] sm:$0x1] %vm55_vm1, %v111_v6  ;;  %v63_v9 = vld [vmem:[%s62_s22] sm:$0x1]  ;;  %s66_s25 = scalar_lea.vmem %s1803_s1, %s983_s7  ;;  %262 = vmatpush.msra.mxu0 %v176_v23  ;;  %1022 = vmatpush.msra.mxu1 %v176_v23  ;;  %v1303_v30 = vld [vmem:[#allocation5 + $0x90] sm:$0xff]  ;;  %v1351_v45 = vld [vmem:[#allocation5 + $0xd8] sm:$0xff] }
  0x18   :  { %116 = vst.msk [vmem:[#allocation2 + $0x39] sm:$0x1] %vm55_vm1, %v115_v7  ;;  %v67_v11 = vld [vmem:[%s66_s25] sm:$0x1]  ;;  %340 = vmatpush.msra.mxu2 %v1265_v12  ;;  %s53_s2 = scalar_lea.vmem %s1803_s1, %s52_s27  ;;  %v168_v35 = vld [vmem:[#allocation5 + $0x10] sm:$0xff]  ;;  %360 = vmatpush.msra.mxu3 %v1326_v40  ;;  %v1356_v46 = vld [vmem:[#allocation5 + $0xc8] sm:$0xff] }
  0x19   :  { %64 = vst.msk [vmem:[#allocation2 + $0x8] sm:$0x1] %vm55_vm1, %v63_v9  ;;  %s58_s7 = scalar_lea.vmem %s1803_s1, %s981_s28  ;;  %v1292_v22 = vld [vmem:[#allocation5 + $0xc0] sm:$0xff]  ;;  %v1361_v48 = vld [vmem:[#allocation5 + $0xb8] sm:$0xff]  ;;  %v1367_v49 = vld [vmem:[#allocation5 + $0xa8] sm:$0xff]  ;;  %s989_s9 = sld [smem:[#allocation4 + $0xc]] }
  0x1a   :  { %68 = vst.msk [vmem:[#allocation2 + $0x9] sm:$0x1] %vm55_vm1, %v67_v11  ;;  %341 = vmatpush.msra.mxu2 %v1268_v14  ;;  %v54_v25 = vld [vmem:[%s53_s2] sm:$0x1]  ;;  %361 = vmatpush.msra.mxu3 %v1331_v41  ;;  %v1372_v50 = vld [vmem:[#allocation5 + $0x98] sm:$0xff]  ;;  %v1377_v51 = vld [vmem:[#allocation5 + $0x88] sm:$0xff]  ;;  %s86_s14 = scalar_lea.vmem %s1803_s1, %s988_s8 }
  0x1b   :  { %v59_v26 = vld [vmem:[%s58_s7] sm:$0x1]  ;;  %56 = vst.msk [vmem:[#allocation2] sm:$0x1] %vm55_vm1, %v54_v25  ;;  %v181_v55 = vld [vmem:[#allocation5 + $0x78] sm:$0xff]  ;;  %v179_v56 = vld [vmem:[#allocation5 + $0x68] sm:$0xff] }
  0x1c   :  { %342 = vmatpush.msra.mxu2 %v1272_v15  ;;  %v174_v27 = vld [vmem:[#allocation5 + $0x40] sm:$0xff]  ;;  %60 = vst.msk [vmem:[#allocation2 + $0x1] sm:$0x1] %vm55_vm1, %v59_v26  ;;  %362 = vmatpush.msra.mxu3 %v1336_v42  ;;  %v177_v57 = vld [vmem:[#allocation5 + $0x58] sm:$0xff]  ;;  %v175_v58 = vld [vmem:[#allocation5 + $0x48] sm:$0xff]  ;;  %s990_s15 = sld [smem:[#allocation4 + $0x5]] }
  0x1d   :  { %v124_v13 = vld [vmem:[#allocation2 + $0x30] sm:$0xff]  ;;  %v1298_v28 = vld [vmem:[#allocation5 + $0xa0] sm:$0xff]  ;;  %263 = vmatpush.msra.mxu0 %v174_v27  ;;  %1023 = vmatpush.msra.mxu1 %v174_v27  ;;  %v173_v59 = vld [vmem:[#allocation5 + $0x38] sm:$0xff]  ;;  %s991_s19 = sld [smem:[#allocation4 + $0xd]]  ;;  %s1173_s27 = smov 64  }
  0x1e   :  { %126 = vrot.lane.b32.xlu0 %v124_v13, %s1172_s26  ;;  %343 = vmatpush.msra.mxu2 %v1275_v16  ;;  %v170_v32 = vld [vmem:[#allocation5 + $0x20] sm:$0xff]  ;;  %v171_v60 = vld [vmem:[#allocation5 + $0x28] sm:$0xff]  ;;  %v169_v61 = vld [vmem:[#allocation5 + $0x18] sm:$0xff]  ;;  %s986_s28 = sld [smem:[#allocation4 + $0x3]] }
  0x1f   :  { %v117_v17 = vld [vmem:[#allocation2 + $0x38] sm:$0xff]  ;;  %264 = vmatpush.msra.mxu0 %v172_v29  ;;  %v1308_v33 = vld [vmem:[#allocation5 + $0x80] sm:$0xff]  ;;  %1024 = vmatpush.msra.mxu1 %v172_v29  ;;  %v167_v62 = vld [vmem:[#allocation5 + $0x8] sm:$0xff]  ;;  %s90_s18 = scalar_lea.vmem %s1803_s1, %s989_s9  ;;  %s987_s0 = sld [smem:[#allocation4 + $0xb]] }
  0x20   :  { %344 = vmatpush.msra.mxu2 %v1278_v18  ;;  %v166_v37 = vld [vmem:[#allocation5] sm:$0xff]  ;;  %363 = vmatpush.msra.mxu3 %v1343_v43  ;;  %s984_s9 = sld [smem:[#allocation4 + $0x2]] }
  0x21   :  { %265 = vmatpush.msra.mxu0 %v170_v32  ;;  %1025 = vmatpush.msra.mxu1 %v170_v32  ;;  %v1480_v4 = vld [vmem:[%s1806_s4] ss:$8 sm:$0x3]  ;;  %s985_s10 = sld [smem:[#allocation4 + $0xa]] }
  0x22   :  { %345 = vmatpush.msra.mxu2 %v1286_v20  ;;  %364 = vmatpush.msra.mxu3 %v1346_v44  ;;  %v1489_v7 = vperm.slane %v1480_v4, 0  ;;  %v87_v13 = vld [vmem:[%s86_s14] sm:$0x1]  ;;  %s94_s22 = scalar_lea.vmem %s1803_s1, %s990_s15 }
  0x23   :  { %266 = vmatpush.msra.mxu0 %v168_v35  ;;  %1026 = vmatpush.msra.mxu1 %v168_v35  ;;  %88 = vst.msk [vmem:[#allocation2 + $0x20] sm:$0x1] %vm55_vm1, %v87_v13  ;;  %s98_s25 = scalar_lea.vmem %s1803_s1, %s991_s19  ;;  %v95_v25 = vld [vmem:[%s94_s22] sm:$0x1]  ;;  %v1566_v13 = vld [vmem:[%s1806_s4 + $0x1] ss:$0 sm:$0xff] }
  0x24   :  { %346 = vmatpush.msra.mxu2 %v1292_v22  ;;  %365 = vmatpush.msra.mxu3 %v1351_v45  ;;  %v99_v26 = vld [vmem:[%s98_s25] sm:$0x1]  ;;  %96 = vst.msk [vmem:[#allocation2 + $0x28] sm:$0x1] %vm55_vm1, %v95_v25  ;;  %s78_s30 = scalar_lea.vmem %s1803_s1, %s986_s28  ;;  %s1174_s22 = smov [#allocation8]  }
  0x25   :  { %267 = vmatpush.msra.mxu0 %v166_v37  ;;  %1027 = vmatpush.msra.mxu1 %v166_v37  ;;  %100 = vst.msk [vmem:[#allocation2 + $0x29] sm:$0x1] %vm55_vm1, %v99_v26  ;;  %s82_s8 = scalar_lea.vmem %s1803_s1, %s987_s0  ;;  %s953_s23 = sshll.u32 %s1174_s22, 4  ;;  %s954_s23 = int_to_ptr.vmem [resolvable:$true] %s953_s23 }
  0x26   :  { %119 = vrot.lane.b32.xlu0 %v117_v17, %s1172_s26  ;;  %347 = vmatpush.msra.mxu2 %v1294_v24  ;;  %v91_v17 = vld [vmem:[%s90_s18] sm:$0x1]  ;;  %s70_s13 = scalar_lea.vmem %s1803_s1, %s984_s9  ;;  %s955_s25 = sshll.u32 %s1807_s5, 4  ;;  %s956_s25 = int_to_ptr.hbm [resolvable:$true] %s955_s25 }
  0x27   :  { %475 = vmatpush.msrb.mxu0 %v1228_v1  ;;  %366 = vmatpush.msra.mxu3 %v1356_v46  ;;  %92 = vst.msk [vmem:[#allocation2 + $0x21] sm:$0x1] %vm55_vm1, %v91_v17  ;;  %s74_s16 = scalar_lea.vmem %s1803_s1, %s985_s10 }
  0x28   :  { %348 = vmatpush.msra.mxu2 %v1298_v28  ;;  %301 = vmatpush.msrb.mxu1 %v181_v55 }
  0x29   :  { %476 = vmatpush.msrb.mxu0 %v1230_v2  ;;  %367 = vmatpush.msra.mxu3 %v1361_v48 }
  0x2a   :  { %349 = vmatpush.msra.mxu2 %v1303_v30  ;;  %302 = vmatpush.msrb.mxu1 %v179_v56 }
  0x2b   :  { %477 = vmatpush.msrb.mxu0 %v1242_v5  ;;  %368 = vmatpush.msra.mxu3 %v1367_v49 }
  0x2c   :  { %350 = vmatpush.msra.mxu2 %v1308_v33  ;;  %303 = vmatpush.msrb.mxu1 %v177_v57  ;;  %v130_v32 = vld [vmem:[#allocation2 + $0x28] sm:$0xff] }
  0x2d   :  { %351 = vmatmul.f32.vlgmr.msra.gmra.mxu2 %v1171_v0  ;;  %478 = vmatpush.msrb.mxu0 %v1250_v8 }
  0x2e   :  { %405 = vmatpush.msrb.mxu2 %v1228_v1  ;;  %369 = vmatpush.msra.mxu3 %v1372_v50 }
  0x2f   :  { %479 = vmatpush.msrb.mxu0 %v1260_v10  ;;  %304 = vmatpush.msrb.mxu1 %v175_v58 }
  0x30   :  { %406 = vmatpush.msrb.mxu2 %v1230_v2  ;;  %370 = vmatpush.msra.mxu3 %v1377_v51 }
  0x31   :  { %480 = vmatpush.msrb.mxu0 %v1265_v12  ;;  %371 = vmatmul.f32.vlgmr.msra.gmra.mxu3 %v1171_v0 }
  0x32   :  { %407 = vmatpush.msrb.mxu2 %v1242_v5  ;;  %425 = vmatpush.msrb.mxu3 %v1305_v31 }
  0x33   :  { %481 = vmatpush.msrb.mxu0 %v1268_v14  ;;  %305 = vmatpush.msrb.mxu1 %v173_v59  ;;  %v136_v59 = vld [vmem:[#allocation2 + $0x20] sm:$0xff] }
  0x34   :  { %408 = vmatpush.msrb.mxu2 %v1250_v8  ;;  %426 = vmatpush.msrb.mxu3 %v1310_v34 }
  0x35   :  { %482 = vmatpush.msrb.mxu0 %v1272_v15  ;;  %306 = vmatpush.msrb.mxu1 %v171_v60  ;;  %v79_v60 = vld [vmem:[%s78_s30] sm:$0x1] }
  0x36   :  { %409 = vmatpush.msrb.mxu2 %v1260_v10  ;;  %427 = vmatpush.msrb.mxu3 %v1314_v36  ;;  %80 = vst.msk [vmem:[#allocation2 + $0x18] sm:$0x1] %vm55_vm1, %v79_v60 }
  0x37   :  { %483 = vmatpush.msrb.mxu0 %v1275_v16  ;;  %307 = vmatpush.msrb.mxu1 %v169_v61  ;;  %v83_v61 = vld [vmem:[%s82_s8] sm:$0x1] }
  0x38   :  { %410 = vmatpush.msrb.mxu2 %v1265_v12  ;;  %428 = vmatpush.msrb.mxu3 %v1318_v38  ;;  %84 = vst.msk [vmem:[#allocation2 + $0x19] sm:$0x1] %vm55_vm1, %v83_v61 }
  0x39   :  { %484 = vmatpush.msrb.mxu0 %v1278_v18  ;;  %308 = vmatpush.msrb.mxu1 %v167_v62 }
  0x3a   :  { %411 = vmatpush.msrb.mxu2 %v1268_v14  ;;  %429 = vmatpush.msrb.mxu3 %v1323_v39 }
  0x3b   :  { %485 = vmatpush.msrb.mxu0 %v1286_v20  ;;  %132 = vrot.lane.b32.xlu0 %v130_v32, %s1172_s26 }
  0x3c   :  { %412 = vmatpush.msrb.mxu2 %v1272_v15  ;;  %430 = vmatpush.msrb.mxu3 %v1326_v40 }
  0x3d   :  { %486 = vmatpush.msrb.mxu0 %v1292_v22 }
  0x3e   :  { %413 = vmatpush.msrb.mxu2 %v1275_v16  ;;  %431 = vmatpush.msrb.mxu3 %v1331_v41 }
  0x3f   :  { %487 = vmatpush.msrb.mxu0 %v1294_v24 }
  0x40   :  { %414 = vmatpush.msrb.mxu2 %v1278_v18  ;;  %432 = vmatpush.msrb.mxu3 %v1336_v42 }
  0x41   :  { %488 = vmatpush.msrb.mxu0 %v1298_v28 }
  0x42   :  { %415 = vmatpush.msrb.mxu2 %v1286_v20  ;;  %433 = vmatpush.msrb.mxu3 %v1343_v43 }
  0x43   :  { %489 = vmatpush.msrb.mxu0 %v1303_v30 }
  0x44   :  { %416 = vmatpush.msrb.mxu2 %v1292_v22  ;;  %434 = vmatpush.msrb.mxu3 %v1346_v44 }
  0x45   :  { %490 = vmatpush.msrb.mxu0 %v1308_v33 }
  0x46   :  { %417 = vmatpush.msrb.mxu2 %v1294_v24  ;;  %435 = vmatpush.msrb.mxu3 %v1351_v45 }
  0x48   :  { %418 = vmatpush.msrb.mxu2 %v1298_v28  ;;  %436 = vmatpush.msrb.mxu3 %v1356_v46 }
  0x4a   :  { %419 = vmatpush.msrb.mxu2 %v1303_v30  ;;  %437 = vmatpush.msrb.mxu3 %v1361_v48 }
  0x4c   :  { %420 = vmatpush.msrb.mxu2 %v1308_v33  ;;  %438 = vmatpush.msrb.mxu3 %v1367_v49 }
  0x4e   :  { %545 = vmatpush.msra.mxu2 %v1228_v1  ;;  %439 = vmatpush.msrb.mxu3 %v1372_v50 }
  0x50   :  { %546 = vmatpush.msra.mxu2 %v1230_v2  ;;  %440 = vmatpush.msrb.mxu3 %v1377_v51 }
  0x52   :  { %547 = vmatpush.msra.mxu2 %v1242_v5  ;;  %565 = vmatpush.msra.mxu3 %v1305_v31 }
  0x54   :  { %548 = vmatpush.msra.mxu2 %v1250_v8  ;;  %566 = vmatpush.msra.mxu3 %v1310_v34 }
  0x56   :  { %549 = vmatpush.msra.mxu2 %v1260_v10  ;;  %567 = vmatpush.msra.mxu3 %v1314_v36 }
  0x58   :  { %550 = vmatpush.msra.mxu2 %v1265_v12  ;;  %568 = vmatpush.msra.mxu3 %v1318_v38 }
  0x5a   :  { %551 = vmatpush.msra.mxu2 %v1268_v14  ;;  %569 = vmatpush.msra.mxu3 %v1323_v39 }
  0x5c   :  { %552 = vmatpush.msra.mxu2 %v1272_v15  ;;  %570 = vmatpush.msra.mxu3 %v1326_v40 }
  0x5e   :  { %553 = vmatpush.msra.mxu2 %v1275_v16  ;;  %571 = vmatpush.msra.mxu3 %v1331_v41 }
  0x60   :  { %554 = vmatpush.msra.mxu2 %v1278_v18  ;;  %572 = vmatpush.msra.mxu3 %v1336_v42 }
  0x62   :  { %555 = vmatpush.msra.mxu2 %v1286_v20  ;;  %573 = vmatpush.msra.mxu3 %v1343_v43 }
  0x64   :  { %556 = vmatpush.msra.mxu2 %v1292_v22  ;;  %574 = vmatpush.msra.mxu3 %v1346_v44 }
  0x66   :  { %557 = vmatpush.msra.mxu2 %v1294_v24  ;;  %575 = vmatpush.msra.mxu3 %v1351_v45 }
  0x68   :  { %558 = vmatpush.msra.mxu2 %v1298_v28  ;;  %576 = vmatpush.msra.mxu3 %v1356_v46 }
  0x6a   :  { %559 = vmatpush.msra.mxu2 %v1303_v30  ;;  %577 = vmatpush.msra.mxu3 %v1361_v48 }
  0x6c   :  { %560 = vmatpush.msra.mxu2 %v1308_v33  ;;  %578 = vmatpush.msra.mxu3 %v1367_v49 }
  0x6e   :  { %579 = vmatpush.msra.mxu3 %v1372_v50 }
  0x70   :  { %580 = vmatpush.msra.mxu3 %v1377_v51 }
  0x90   :  { %v127_v47 = vpop.permute.xlu0 %126 }
  0x91   :  { %129 = vst.msk [vmem:[#allocation2 + $0x8] sm:$0xff] %vm122_vm2, %v127_v47 }
  0x98   :  { %v120_v52 = vpop.permute.xlu0 %119  ;;  %v1382_v53 = vld [vmem:[#allocation2 + $0x8] sm:$0xff] }
  0x99   :  { %123 = vst.msk [vmem:[#allocation2] sm:$0xff] %vm122_vm2, %v120_v52  ;;  %156 = vrot.lane.b32.xlu1 %v1382_v53, %s1172_s26 }
  0xa0   :  { %v1399_v54 = vld [vmem:[#allocation2] sm:$0xff] }
  0xa1   :  { %996 = vmatmul.msk.f32.vlgmr.msra.gmra.mxu0 %vm43_vm0, %v1399_v54  ;;  %162 = vrot.lane.b32.xlu1 %v1399_v54, %s1172_s26 }
  0xa2   :  { %615 = vmatpush.msra.mxu0 %v1228_v1 }
  0xa4   :  { %616 = vmatpush.msra.mxu0 %v1230_v2 }
  0xa6   :  { %617 = vmatpush.msra.mxu0 %v1242_v5 }
  0xa8   :  { %618 = vmatpush.msra.mxu0 %v1250_v8 }
  0xa9   :  { %997 = vmatmul.msk.f32.gmra.mxu0 %vm43_vm0, %v1382_v53 }
  0xaa   :  { %619 = vmatpush.msra.mxu0 %v1260_v10 }
  0xac   :  { %620 = vmatpush.msra.mxu0 %v1265_v12 }
  0xae   :  { %621 = vmatpush.msra.mxu0 %v1268_v14 }
  0xb0   :  { %622 = vmatpush.msra.mxu0 %v1272_v15  ;;  %v352_v11 = vpop.f32.mrf.mxu2 }
  0xb2   :  { %623 = vmatpush.msra.mxu0 %v1275_v16 }
  0xb4   :  { %624 = vmatpush.msra.mxu0 %v1278_v18  ;;  %v372_v17 = vpop.f32.mrf.mxu3 }
  0xb6   :  { %625 = vmatpush.msra.mxu0 %v1286_v20 }
  0xb8   :  { %626 = vmatpush.msra.mxu0 %v1292_v22 }
  0xba   :  { %627 = vmatpush.msra.mxu0 %v1294_v24 }
  0xbc   :  { %628 = vmatpush.msra.mxu0 %v1298_v28 }
  0xbe   :  { %629 = vmatpush.msra.mxu0 %v1303_v30 }
  0xc0   :  { %630 = vmatpush.msra.mxu0 %v1308_v33 }
 0x10b   :  { %v157_v63 = vpop.permute.xlu1 %156 }
 0x10c   :  { %159 = vst.msk [vmem:[#allocation2 + $0x30] sm:$0xff] %vm122_vm2, %v157_v63  ;;  %v71_v63 = vld [vmem:[%s70_s13] sm:$0x1] }
 0x10d   :  { %72 = vst.msk [vmem:[#allocation2 + $0x10] sm:$0x1] %vm55_vm1, %v71_v63 }
 0x113   :  { %v163_v0 = vpop.permute.xlu1 %162  ;;  %v1470_v3 = vld [vmem:[#allocation2 + $0x30] sm:$0xff] }
 0x114   :  { %165 = vst.msk [vmem:[#allocation2 + $0x38] sm:$0xff] %vm122_vm2, %v163_v0  ;;  %1002 = vmatmul.msk.f32.vlgmr.msra.gmra.mxu1 %vm43_vm0, %v1470_v3  ;;  %v75_v0 = vld [vmem:[%s74_s16] sm:$0x1] }
 0x115   :  { %495 = vmatpush.msra.mxu1 %v1305_v31  ;;  %76 = vst.msk [vmem:[#allocation2 + $0x11] sm:$0x1] %vm55_vm1, %v75_v0 }
 0x117   :  { %496 = vmatpush.msra.mxu1 %v1310_v34 }
 0x119   :  { %497 = vmatpush.msra.mxu1 %v1314_v36 }
 0x11b   :  { %v1486_v6 = vld [vmem:[#allocation2 + $0x38] sm:$0xff]  ;;  %498 = vmatpush.msra.mxu1 %v1318_v38 }
 0x11c   :  { %1003 = vmatmul.msk.f32.gmra.mxu1 %vm43_vm0, %v1486_v6 }
 0x11d   :  { %499 = vmatpush.msra.mxu1 %v1323_v39 }
 0x11e   :  { %v269_v9 = vpop.f32.mrf.mxu0 }
 0x11f   :  { %v270_v19 = vadd.f32 %v269_v9, %v1489_v7  ;;  %500 = vmatpush.msra.mxu1 %v1326_v40 }
 0x121   :  { %v375_v21 = vadd.f32 %v352_v11, %v270_v19  ;;  %501 = vmatpush.msra.mxu1 %v1331_v41  ;;  %v395_v19 = vadd.f32 %v372_v17, %v1566_v13 }
 0x123   :  { %v1012_v23 = vmul.f32 -1.442695, %v375_v21  ;;  %502 = vmatpush.msra.mxu1 %v1336_v42  ;;  %v1570_v21 = vperm.slane %v1480_v4, 1 }
 0x124   :  { %1004 = vmatmul.msk.f32.vlgmr.msrb.gmra.mxu1 %vm43_vm0, %v1399_v54 }
 0x125   :  { %1036 = vpow2.f32 %v1012_v23  ;;  %503 = vmatpush.msra.mxu1 %v1343_v43 }
 0x127   :  { %504 = vmatpush.msra.mxu1 %v1346_v44 }
 0x129   :  { %505 = vmatpush.msra.mxu1 %v1351_v45 }
 0x12b   :  { %v1037_v27 = vpop.eup %1036  ;;  %506 = vmatpush.msra.mxu1 %v1356_v46 }
 0x12c   :  { %v379_v29 = vadd.f32 1.0, %v1037_v27  ;;  %1005 = vmatmul.msk.f32.gmra.mxu1 %vm43_vm0, %v1382_v53 }
 0x12d   :  { %507 = vmatpush.msra.mxu1 %v1361_v48 }
 0x12e   :  { %1038 = vrcp.f32 %v379_v29  ;;  %v391_v52 = vand.u32 2147483648, %v379_v29  ;;  %v389_v54 = vand.u32 2147483647, %v379_v29  ;;  %vm385_vm4 = vweird.f32 %v379_v29 }
 0x12f   :  { %508 = vmatpush.msra.mxu1 %v1367_v49 }
 0x130   :  { %v392_v56 = vor.u32 1.1754944e-38, %v391_v52  ;;  %vm390_vm6 = vcmp.eq.f32.partialorder %v389_v54, 8.507059e+37 }
 0x131   :  { %509 = vmatpush.msra.mxu1 %v1372_v50 }
 0x133   :  { %510 = vmatpush.msra.mxu1 %v1377_v51 }
 0x134   :  { %v1039_v35 = vpop.eup %1038 }
 0x135   :  { %635 = vmatpush.msrb.mxu1 %v1305_v31  ;;  %v381_v37 = vmul.f32 %v1039_v35, %v379_v29  ;;  %vm386_vm3 = vweird.f32 %v1039_v35  ;;  %v133_v29 = vpop.permute.xlu0 %132 }
 0x136   :  { %vm387_vm5 = vmor %vm385_vm4, %vm386_vm3  ;;  %135 = vst.msk [vmem:[#allocation2 + $0x10] sm:$0xff] %vm122_vm2, %v133_v29 }
 0x137   :  { %636 = vmatpush.msrb.mxu1 %v1310_v34  ;;  %v382_v47 = vsub.f32 1.0, %v381_v37 }
 0x139   :  { %637 = vmatpush.msrb.mxu1 %v1314_v36  ;;  %v383_v53 = vmul.f32 %v1039_v35, %v382_v47 }
 0x13b   :  { %638 = vmatpush.msrb.mxu1 %v1318_v38  ;;  %v384_v55 = vadd.f32 %v1039_v35, %v383_v53 }
 0x13d   :  { %639 = vmatpush.msrb.mxu1 %v1323_v39  ;;  %v388_v57 = vsel %vm387_vm5, %v1039_v35, %v384_v55  ;;  %v148_v37 = vld [vmem:[#allocation2 + $0x10] sm:$0xff] }
 0x13e   :  { %v393_v58 = vsel %vm390_vm6, %v392_v56, %v388_v57  ;;  %1006 = vmatmul.msk.f32.gmra.mxu1 %vm43_vm0, %v148_v37  ;;  %998 = vmatmul.msk.f32.gmra.mxu0 %vm43_vm0, %v148_v37 }
 0x13f   :  { %640 = vmatpush.msrb.mxu1 %v1326_v40  ;;  %399 = vrot.lane.b32.xlu2 %v393_v58, %s1173_s27  ;;  %v396_v26 = vmul.f32 %v395_v19, %v393_v58 }
 0x141   :  { %641 = vmatpush.msrb.mxu1 %v1331_v41 }
 0x143   :  { %642 = vmatpush.msrb.mxu1 %v1336_v42 }
 0x145   :  { %643 = vmatpush.msrb.mxu1 %v1343_v43 }
 0x147   :  { %644 = vmatpush.msrb.mxu1 %v1346_v44  ;;  %138 = vrot.lane.b32.xlu2 %v136_v59, %s1172_s26  ;;  %v272_v59 = vpop.f32.mrf.mxu0 }
 0x148   :  { %v273_v60 = vadd.f32 %v272_v59, %v1489_v7 }
 0x149   :  { %645 = vmatpush.msrb.mxu1 %v1351_v45 }
 0x14b   :  { %646 = vmatpush.msrb.mxu1 %v1356_v46 }
 0x14d   :  { %647 = vmatpush.msrb.mxu1 %v1361_v48 }
 0x14f   :  { %648 = vmatpush.msrb.mxu1 %v1367_v49  ;;  %150 = vrot.lane.b32.xlu2 %v148_v37, %s1172_s26 }
 0x151   :  { %649 = vmatpush.msrb.mxu1 %v1372_v50 }
 0x153   :  { %650 = vmatpush.msrb.mxu1 %v1377_v51 }
 0x191   :  { %v1557_v62 = vpop.f32.mrf.mxu1 }
 0x199   :  { %v400_v9 = vpop.permute.xlu2 %399  ;;  %v1561_v11 = vpop.f32.mrf.mxu1 }
 0x19a   :  { %v401_v47 = vsub.f32 1.0, %v400_v9  ;;  %v403_v52 = vmul.f32 0.0, %v400_v9 }
 0x1a1   :  { %v139_v23 = vpop.permute.xlu2 %138  ;;  %v310_v25 = vpop.f32.mrf.mxu1 }
 0x1a2   :  { %141 = vst.msk [vmem:[#allocation2 + $0x18] sm:$0xff] %vm122_vm2, %v139_v23  ;;  %v311_v27 = vadd.f32 %v310_v25, %v1570_v21 }
 0x1a4   :  { %v397_v32 = vadd.f32 %v396_v26, %v311_v27 }
 0x1a6   :  { %1040 = vtanh.f32 %v397_v32 }
 0x1a9   :  { %v142_v35 = vld [vmem:[#allocation2 + $0x18] sm:$0xff]  ;;  %v151_v55 = vpop.permute.xlu2 %150 }
 0x1aa   :  { %144 = vrot.lane.b32.xlu1 %v142_v35, %s1172_s26  ;;  %1007 = vmatmul.msk.f32.gmra.mxu1 %vm43_vm0, %v142_v35  ;;  %153 = vst.msk [vmem:[#allocation2 + $0x28] sm:$0xff] %vm122_vm2, %v151_v55 }
 0x1ab   :  { %999 = vmatmul.msk.f32.gmra.mxu0 %vm43_vm0, %v142_v35 }
 0x1ac   :  { %v1041_v4 = vpop.eup %1040 }
 0x1ad   :  { %v402_v53 = vmul.f32 %v1041_v4, %v401_v47  ;;  %v313_v4 = vpop.f32.mrf.mxu1 }
 0x1af   :  { %v1579_v54 = vadd.f32 %v403_v52, %v402_v53  ;;  %v314_v53 = vadd.f32 %v313_v4, %v1570_v21 }
 0x1b1   :  { %421 = vmatmul.f32.vlgmr.msrb.gmra.mxu2 %v1579_v54  ;;  %441 = vmatmul.f32.vlgmr.msrb.gmra.mxu3 %v1579_v54  ;;  %v220_v58 = vld [vmem:[#allocation2 + $0x28] sm:$0xff] }
 0x1b2   :  { %685 = vmatpush.msrb.mxu2 %v1228_v1  ;;  %705 = vmatpush.msrb.mxu3 %v1305_v31 }
 0x1b4   :  { %686 = vmatpush.msrb.mxu2 %v1230_v2  ;;  %706 = vmatpush.msrb.mxu3 %v1310_v34 }
 0x1b6   :  { %687 = vmatpush.msrb.mxu2 %v1242_v5  ;;  %707 = vmatpush.msrb.mxu3 %v1314_v36 }
 0x1b8   :  { %688 = vmatpush.msrb.mxu2 %v1250_v8  ;;  %708 = vmatpush.msrb.mxu3 %v1318_v38 }
 0x1ba   :  { %689 = vmatpush.msrb.mxu2 %v1260_v10  ;;  %709 = vmatpush.msrb.mxu3 %v1323_v39 }
 0x1bc   :  { %690 = vmatpush.msrb.mxu2 %v1265_v12  ;;  %710 = vmatpush.msrb.mxu3 %v1326_v40 }
 0x1be   :  { %691 = vmatpush.msrb.mxu2 %v1268_v14  ;;  %711 = vmatpush.msrb.mxu3 %v1331_v41 }
 0x1c0   :  { %692 = vmatpush.msrb.mxu2 %v1272_v15  ;;  %712 = vmatpush.msrb.mxu3 %v1336_v42 }
 0x1c2   :  { %693 = vmatpush.msrb.mxu2 %v1275_v16  ;;  %713 = vmatpush.msrb.mxu3 %v1343_v43 }
 0x1c4   :  { %694 = vmatpush.msrb.mxu2 %v1278_v18  ;;  %714 = vmatpush.msrb.mxu3 %v1346_v44 }
 0x1c6   :  { %695 = vmatpush.msrb.mxu2 %v1286_v20  ;;  %715 = vmatpush.msrb.mxu3 %v1351_v45 }
 0x1c8   :  { %696 = vmatpush.msrb.mxu2 %v1292_v22  ;;  %716 = vmatpush.msrb.mxu3 %v1356_v46 }
 0x1ca   :  { %697 = vmatpush.msrb.mxu2 %v1294_v24  ;;  %717 = vmatpush.msrb.mxu3 %v1361_v48 }
 0x1cc   :  { %698 = vmatpush.msrb.mxu2 %v1298_v28  ;;  %718 = vmatpush.msrb.mxu3 %v1367_v49 }
 0x1ce   :  { %699 = vmatpush.msrb.mxu2 %v1303_v30  ;;  %719 = vmatpush.msrb.mxu3 %v1372_v50 }
 0x1d0   :  { %700 = vmatpush.msrb.mxu2 %v1308_v33  ;;  %720 = vmatpush.msrb.mxu3 %v1377_v51 }
 0x21c   :  { %v145_v56 = vpop.permute.xlu1 %144 }
 0x21d   :  { %147 = vst.msk [vmem:[#allocation2 + $0x20] sm:$0xff] %vm122_vm2, %v145_v56 }
 0x224   :  { %v219_v57 = vld [vmem:[#allocation2 + $0x20] sm:$0xff] }
 0x225   :  { %1008 = vmatmul.msk.f32.gmra.mxu1 %vm43_vm0, %v219_v57  ;;  %1000 = vmatmul.msk.f32.gmra.mxu0 %vm43_vm0, %v219_v57 }
 0x22d   :  { %1009 = vmatmul.msk.f32.gmra.mxu1 %vm43_vm0, %v220_v58  ;;  %1001 = vmatmul.msk.f32.gmra.mxu0 %vm43_vm0, %v220_v58 }
 0x234   :  { %v422_v61 = vpop.f32.mrf.mxu2 }
 0x235   :  { %v445_v63 = vadd.f32 %v422_v61, %v273_v60  ;;  %1010 = vmatmul.msk.f32.gmra.mxu1 %vm43_vm0, %v1470_v3 }
 0x237   :  { %v1013_v0 = vmul.f32 -1.442695, %v445_v63 }
 0x239   :  { %1042 = vpow2.f32 %v1013_v0 }
 0x23d   :  { %1011 = vmatmul.msk.f32.gmra.mxu1 %vm43_vm0, %v1486_v6  ;;  %v442_v6 = vpop.f32.mrf.mxu3 }
 0x23e   :  { %v465_v47 = vadd.f32 %v442_v6, %v1566_v13 }
 0x23f   :  { %v1043_v9 = vpop.eup %1042 }
 0x240   :  { %v449_v17 = vadd.f32 1.0, %v1043_v9 }
 0x242   :  { %1044 = vrcp.f32 %v449_v17  ;;  %v461_v26 = vand.u32 2147483648, %v449_v17  ;;  %v459_v29 = vand.u32 2147483647, %v449_v17  ;;  %vm455_vm8 = vweird.f32 %v449_v17 }
 0x244   :  { %v462_v35 = vor.u32 1.1754944e-38, %v461_v26  ;;  %vm460_vm10 = vcmp.eq.f32.partialorder %v459_v29, 8.507059e+37 }
 0x248   :  { %v1045_v19 = vpop.eup %1044 }
 0x249   :  { %v451_v23 = vmul.f32 %v1045_v19, %v449_v17  ;;  %vm456_vm7 = vweird.f32 %v1045_v19 }
 0x24a   :  { %vm457_vm9 = vmor %vm455_vm8, %vm456_vm7 }
 0x24b   :  { %v452_v25 = vsub.f32 1.0, %v451_v23 }
 0x24d   :  { %v453_v27 = vmul.f32 %v1045_v19, %v452_v25  ;;  %v316_v25 = vpop.f32.mrf.mxu1 }
 0x24f   :  { %v454_v32 = vadd.f32 %v1045_v19, %v453_v27 }
 0x251   :  { %v458_v3 = vsel %vm457_vm9, %v1045_v19, %v454_v32 }
 0x252   :  { %v463_v37 = vsel %vm460_vm10, %v462_v35, %v458_v3 }
 0x253   :  { %469 = vrot.lane.b32.xlu0 %v463_v37, %s1173_s27  ;;  %v466_v52 = vmul.f32 %v465_v47, %v463_v37  ;;  %v317_v47 = vadd.f32 %v316_v25, %v1570_v21 }
 0x255   :  { %v467_v55 = vadd.f32 %v466_v52, %v314_v53  ;;  %v1676_v26 = vpop.f32.mrf.mxu1 }
 0x257   :  { %1046 = vtanh.f32 %v467_v55 }
 0x25d   :  { %v1047_v58 = vpop.eup %1046 }
 0x2a2   :  { %v1678_v27 = vpop.f32.mrf.mxu1 }
 0x2aa   :  { %v1680_v29 = vpop.f32.mrf.mxu1 }
 0x2b2   :  { %v1682_v32 = vpop.f32.mrf.mxu1 }
 0x2ba   :  { %v1684_v35 = vpop.f32.mrf.mxu1 }
 0x2c5   :  { %v470_v56 = vpop.permute.xlu0 %469 }
 0x2c6   :  { %v471_v57 = vsub.f32 1.0, %v470_v56  ;;  %v473_v60 = vmul.f32 %v470_v56, %v1579_v54 }
 0x2c8   :  { %v472_v59 = vmul.f32 %v1047_v58, %v471_v57 }
 0x2ca   :  { %v1632_v61 = vadd.f32 %v473_v60, %v472_v59  ;;  %v1088_v59 = vld [vmem:[#allocation5 + $0x170] sm:$0xff]  ;;  %v1089_v60 = vld [vmem:[#allocation5 + $0x160] sm:$0xff] }
 0x2cc   :  { %491 = vmatmul.f32.vlgmr.msrb.gmra.mxu0 %v1632_v61  ;;  %511 = vmatmul.f32.vlgmr.msra.gmra.mxu1 %v1632_v61 }
 0x2cd   :  { %755 = vmatpush.msrb.mxu0 %v1228_v1  ;;  %775 = vmatpush.msra.mxu1 %v1305_v31  ;;  %v275_v1 = vpop.f32.mrf.mxu0 }
 0x2cf   :  { %756 = vmatpush.msrb.mxu0 %v1230_v2  ;;  %776 = vmatpush.msra.mxu1 %v1310_v34 }
 0x2d1   :  { %757 = vmatpush.msrb.mxu0 %v1242_v5  ;;  %777 = vmatpush.msra.mxu1 %v1314_v36 }
 0x2d3   :  { %758 = vmatpush.msrb.mxu0 %v1250_v8  ;;  %778 = vmatpush.msra.mxu1 %v1318_v38 }
 0x2d5   :  { %759 = vmatpush.msrb.mxu0 %v1260_v10  ;;  %779 = vmatpush.msra.mxu1 %v1323_v39  ;;  %v1668_v2 = vpop.f32.mrf.mxu0  ;;  %v276_v10 = vadd.f32 %v275_v1, %v1489_v7  ;;  %v1090_v1 = vld [vmem:[#allocation5 + $0x150] sm:$0xff] }
 0x2d7   :  { %760 = vmatpush.msrb.mxu0 %v1265_v12  ;;  %780 = vmatpush.msra.mxu1 %v1326_v40 }
 0x2d9   :  { %761 = vmatpush.msrb.mxu0 %v1268_v14  ;;  %781 = vmatpush.msra.mxu1 %v1331_v41 }
 0x2db   :  { %762 = vmatpush.msrb.mxu0 %v1272_v15  ;;  %782 = vmatpush.msra.mxu1 %v1336_v42 }
 0x2dd   :  { %763 = vmatpush.msrb.mxu0 %v1275_v16  ;;  %783 = vmatpush.msra.mxu1 %v1343_v43  ;;  %v1670_v5 = vpop.f32.mrf.mxu0 }
 0x2de   :  { %v282_v25 = vadd.f32 %v1670_v5, %v1489_v7 }
 0x2df   :  { %764 = vmatpush.msrb.mxu0 %v1278_v18  ;;  %784 = vmatpush.msra.mxu1 %v1346_v44 }
 0x2e1   :  { %765 = vmatpush.msrb.mxu0 %v1286_v20  ;;  %785 = vmatpush.msra.mxu1 %v1351_v45 }
 0x2e3   :  { %766 = vmatpush.msrb.mxu0 %v1292_v22  ;;  %786 = vmatpush.msra.mxu1 %v1356_v46 }
 0x2e5   :  { %767 = vmatpush.msrb.mxu0 %v1294_v24  ;;  %787 = vmatpush.msra.mxu1 %v1361_v48  ;;  %v1672_v8 = vpop.f32.mrf.mxu0 }
 0x2e7   :  { %768 = vmatpush.msrb.mxu0 %v1298_v28  ;;  %788 = vmatpush.msra.mxu1 %v1367_v49 }
 0x2e9   :  { %769 = vmatpush.msrb.mxu0 %v1303_v30  ;;  %789 = vmatpush.msra.mxu1 %v1372_v50 }
 0x2eb   :  { %770 = vmatpush.msrb.mxu0 %v1308_v33  ;;  %790 = vmatpush.msra.mxu1 %v1377_v51 }
 0x349   :  { %v492_v12 = vpop.f32.mrf.mxu0  ;;  %v512_v3 = vpop.f32.mrf.mxu1 }
 0x34a   :  { %v515_v14 = vadd.f32 %v492_v12, %v276_v10  ;;  %v535_v37 = vadd.f32 %v512_v3, %v1566_v13  ;;  %v1091_v10 = vld [vmem:[#allocation5 + $0x140] sm:$0xff] }
 0x34b   :  { %v1093_v12 = vld [vmem:[#allocation5 + $0x120] sm:$0xff] }
 0x34c   :  { %v1014_v15 = vmul.f32 -1.442695, %v515_v14 }
 0x34e   :  { %1048 = vpow2.f32 %v1014_v15 }
 0x354   :  { %v1049_v16 = vpop.eup %1048 }
 0x355   :  { %v519_v18 = vadd.f32 1.0, %v1049_v16 }
 0x357   :  { %1050 = vrcp.f32 %v519_v18  ;;  %v531_v54 = vand.u32 2147483648, %v519_v18  ;;  %v529_v0 = vand.u32 2147483647, %v519_v18  ;;  %vm525_vm12 = vweird.f32 %v519_v18 }
 0x359   :  { %v532_v17 = vor.u32 1.1754944e-38, %v531_v54  ;;  %vm530_vm14 = vcmp.eq.f32.partialorder %v529_v0, 8.507059e+37 }
 0x35d   :  { %v1051_v20 = vpop.eup %1050 }
 0x35e   :  { %v521_v22 = vmul.f32 %v1051_v20, %v519_v18  ;;  %vm526_vm11 = vweird.f32 %v1051_v20 }
 0x35f   :  { %vm527_vm13 = vmor %vm525_vm12, %vm526_vm11 }
 0x360   :  { %v522_v24 = vsub.f32 1.0, %v521_v22 }
 0x362   :  { %v523_v63 = vmul.f32 %v1051_v20, %v522_v24  ;;  %v320_v24 = vadd.f32 %v1676_v26, %v1570_v21 }
 0x364   :  { %v524_v9 = vadd.f32 %v1051_v20, %v523_v63 }
 0x366   :  { %v528_v19 = vsel %vm527_vm13, %v1051_v20, %v524_v9 }
 0x367   :  { %v533_v23 = vsel %vm530_vm14, %v532_v17, %v528_v19 }
 0x368   :  { %539 = vrot.lane.b32.xlu1 %v533_v23, %s1173_s27  ;;  %v536_v6 = vmul.f32 %v535_v37, %v533_v23 }
 0x36a   :  { %v537_v4 = vadd.f32 %v536_v6, %v317_v47 }
 0x36c   :  { %1052 = vtanh.f32 %v537_v4 }
 0x372   :  { %v1053_v55 = vpop.eup %1052 }
 0x3da   :  { %v540_v52 = vpop.permute.xlu1 %539 }
 0x3db   :  { %v541_v53 = vsub.f32 1.0, %v540_v52  ;;  %v543_v57 = vmul.f32 %v540_v52, %v1632_v61  ;;  %v1092_v61 = vld [vmem:[#allocation5 + $0x130] sm:$0xff] }
 0x3dd   :  { %v542_v56 = vmul.f32 %v1053_v55, %v541_v53 }
 0x3df   :  { %v1689_v58 = vadd.f32 %v543_v57, %v542_v56 }
 0x3e1   :  { %561 = vmatmul.f32.vlgmr.msra.gmra.mxu2 %v1689_v58  ;;  %581 = vmatmul.f32.vlgmr.msra.gmra.mxu3 %v1689_v58 }
 0x3e2   :  { %825 = vmatpush.msra.mxu2 %v1088_v59  ;;  %845 = vmatpush.msra.mxu3 %v1305_v31  ;;  %v1094_v31 = vld [vmem:[#allocation5 + $0x110] sm:$0xff] }
 0x3e4   :  { %826 = vmatpush.msra.mxu2 %v1089_v60  ;;  %846 = vmatpush.msra.mxu3 %v1310_v34  ;;  %v1095_v34 = vld [vmem:[#allocation5 + $0x100] sm:$0xff] }
 0x3e6   :  { %827 = vmatpush.msra.mxu2 %v1090_v1  ;;  %847 = vmatpush.msra.mxu3 %v1314_v36  ;;  %v1096_v36 = vld [vmem:[#allocation5 + $0xf0] sm:$0xff] }
 0x3e8   :  { %828 = vmatpush.msra.mxu2 %v1091_v10  ;;  %848 = vmatpush.msra.mxu3 %v1318_v38  ;;  %v1097_v38 = vld [vmem:[#allocation5 + $0xe0] sm:$0xff] }
 0x3ea   :  { %829 = vmatpush.msra.mxu2 %v1092_v61  ;;  %849 = vmatpush.msra.mxu3 %v1323_v39  ;;  %v1098_v39 = vld [vmem:[#allocation5 + $0xd0] sm:$0xff]  ;;  %v323_v61 = vadd.f32 %v1678_v27, %v1570_v21 }
 0x3ec   :  { %830 = vmatpush.msra.mxu2 %v1093_v12  ;;  %850 = vmatpush.msra.mxu3 %v1326_v40  ;;  %v1099_v40 = vld [vmem:[#allocation5 + $0xc0] sm:$0xff] }
 0x3ee   :  { %831 = vmatpush.msra.mxu2 %v1094_v31  ;;  %851 = vmatpush.msra.mxu3 %v1331_v41  ;;  %v1100_v41 = vld [vmem:[#allocation5 + $0xb0] sm:$0xff] }
 0x3f0   :  { %832 = vmatpush.msra.mxu2 %v1095_v34  ;;  %852 = vmatpush.msra.mxu3 %v1336_v42  ;;  %v279_v42 = vadd.f32 %v1668_v2, %v1489_v7 }
 0x3f2   :  { %833 = vmatpush.msra.mxu2 %v1096_v36  ;;  %853 = vmatpush.msra.mxu3 %v1343_v43 }
 0x3f4   :  { %834 = vmatpush.msra.mxu2 %v1097_v38  ;;  %854 = vmatpush.msra.mxu3 %v1346_v44 }
 0x3f6   :  { %835 = vmatpush.msra.mxu2 %v1098_v39  ;;  %855 = vmatpush.msra.mxu3 %v1351_v45 }
 0x3f8   :  { %836 = vmatpush.msra.mxu2 %v1099_v40  ;;  %856 = vmatpush.msra.mxu3 %v1356_v46 }
 0x3fa   :  { %837 = vmatpush.msra.mxu2 %v1100_v41  ;;  %857 = vmatpush.msra.mxu3 %v1361_v48 }
 0x3fc   :  { %838 = vmatpush.msra.mxu2 %v1298_v28  ;;  %858 = vmatpush.msra.mxu3 %v1367_v49 }
 0x3fe   :  { %839 = vmatpush.msra.mxu2 %v1303_v30  ;;  %859 = vmatpush.msra.mxu3 %v1372_v50 }
 0x400   :  { %840 = vmatpush.msra.mxu2 %v1308_v33  ;;  %860 = vmatpush.msra.mxu3 %v1377_v51 }
 0x464   :  { %v562_v43 = vpop.f32.mrf.mxu2  ;;  %v582_v18 = vpop.f32.mrf.mxu3 }
 0x465   :  { %v585_v44 = vadd.f32 %v562_v43, %v279_v42  ;;  %v605_v20 = vadd.f32 %v582_v18, %v1566_v13  ;;  %v285_v42 = vadd.f32 %v1672_v8, %v1489_v7  ;;  %v326_v18 = vadd.f32 %v1680_v29, %v1570_v21 }
 0x467   :  { %v1015_v45 = vmul.f32 -1.442695, %v585_v44 }
 0x469   :  { %1054 = vpow2.f32 %v1015_v45 }
 0x46f   :  { %v1055_v46 = vpop.eup %1054 }
 0x470   :  { %v589_v48 = vadd.f32 1.0, %v1055_v46 }
 0x472   :  { %1056 = vrcp.f32 %v589_v48  ;;  %v601_v30 = vand.u32 2147483648, %v589_v48  ;;  %v599_v50 = vand.u32 2147483647, %v589_v48  ;;  %vm595_vm0 = vweird.f32 %v589_v48 }
 0x474   :  { %v602_v51 = vor.u32 1.1754944e-38, %v601_v30  ;;  %vm600_vm2 = vcmp.eq.f32.partialorder %v599_v50, 8.507059e+37 }
 0x478   :  { %v1057_v28 = vpop.eup %1056 }
 0x479   :  { %v591_v49 = vmul.f32 %v1057_v28, %v589_v48  ;;  %vm596_vm15 = vweird.f32 %v1057_v28 }
 0x47a   :  { %vm597_vm1 = vmor %vm595_vm0, %vm596_vm15 }
 0x47b   :  { %v592_v14 = vsub.f32 1.0, %v591_v49 }
 0x47d   :  { %v593_v15 = vmul.f32 %v1057_v28, %v592_v14 }
 0x47f   :  { %v594_v33 = vadd.f32 %v1057_v28, %v593_v15 }
 0x481   :  { %v598_v16 = vsel %vm597_vm1, %v1057_v28, %v594_v33 }
 0x482   :  { %v603_v2 = vsel %vm600_vm2, %v602_v51, %v598_v16 }
 0x483   :  { %609 = vrot.lane.b32.xlu2 %v603_v2, %s1173_s27  ;;  %v606_v22 = vmul.f32 %v605_v20, %v603_v2 }
 0x485   :  { %v607_v54 = vadd.f32 %v606_v22, %v320_v24 }
 0x487   :  { %1058 = vtanh.f32 %v607_v54 }
 0x48d   :  { %v1059_v9 = vpop.eup %1058 }
 0x4dd   :  { %v610_v63 = vpop.permute.xlu2 %609 }
 0x4de   :  { %v611_v0 = vsub.f32 1.0, %v610_v63  ;;  %v613_v19 = vmul.f32 %v610_v63, %v1689_v58 }
 0x4e0   :  { %v612_v17 = vmul.f32 %v1059_v9, %v611_v0 }
 0x4e2   :  { %v614_v23 = vadd.f32 %v613_v19, %v612_v17  ;;  %v288_v19 = vadd.f32 %v1557_v62, %v1489_v7 }
 0x4e4   :  { %631 = vmatmul.f32.vlgmr.msra.gmra.mxu0 %v614_v23  ;;  %651 = vmatmul.f32.vlgmr.msrb.gmra.mxu1 %v614_v23 }
 0x561   :  { %v632_v3 = vpop.f32.mrf.mxu0  ;;  %v652_v58 = vpop.f32.mrf.mxu1 }
 0x562   :  { %v655_v37 = vadd.f32 %v632_v3, %v282_v25  ;;  %v675_v5 = vadd.f32 %v652_v58, %v1566_v13 }
 0x564   :  { %v1016_v6 = vmul.f32 -1.442695, %v655_v37 }
 0x566   :  { %1060 = vpow2.f32 %v1016_v6 }
 0x56c   :  { %v1061_v47 = vpop.eup %1060 }
 0x56d   :  { %v659_v26 = vadd.f32 1.0, %v1061_v47 }
 0x56f   :  { %1062 = vrcp.f32 %v659_v26  ;;  %v671_v55 = vand.u32 2147483648, %v659_v26  ;;  %v669_v57 = vand.u32 2147483647, %v659_v26  ;;  %vm665_vm4 = vweird.f32 %v659_v26 }
 0x571   :  { %v672_v60 = vor.u32 1.1754944e-38, %v671_v55  ;;  %vm670_vm6 = vcmp.eq.f32.partialorder %v669_v57, 8.507059e+37 }
 0x575   :  { %v1063_v4 = vpop.eup %1062 }
 0x576   :  { %v661_v52 = vmul.f32 %v1063_v4, %v659_v26  ;;  %vm666_vm3 = vweird.f32 %v1063_v4 }
 0x577   :  { %vm667_vm5 = vmor %vm665_vm4, %vm666_vm3  ;;  %vm932_vm3 = vcmask 15360   ;;  %vm946_vm4 = vcmask 9216  }
 0x578   :  { %v662_v53 = vsub.f32 1.0, %v661_v52 }
 0x57a   :  { %v663_v56 = vmul.f32 %v1063_v4, %v662_v53 }
 0x57c   :  { %v664_v59 = vadd.f32 %v1063_v4, %v663_v56 }
 0x57e   :  { %v668_v1 = vsel %vm667_vm5, %v1063_v4, %v664_v59 }
 0x57f   :  { %v673_v10 = vsel %vm670_vm6, %v672_v60, %v668_v1  ;;  %v329_v60 = vadd.f32 %v1682_v32, %v1570_v21 }
 0x580   :  { %679 = vrot.lane.b32.xlu0 %v673_v10, %s1173_s27  ;;  %v676_v12 = vmul.f32 %v675_v5, %v673_v10 }
 0x582   :  { %v677_v31 = vadd.f32 %v676_v12, %v323_v61 }
 0x584   :  { %1064 = vtanh.f32 %v677_v31 }
 0x58a   :  { %v1065_v38 = vpop.eup %1064 }
 0x5f2   :  { %v680_v34 = vpop.permute.xlu0 %679 }
 0x5f3   :  { %v681_v36 = vsub.f32 1.0, %v680_v34  ;;  %v683_v40 = vmul.f32 %v680_v34, %v614_v23 }
 0x5f5   :  { %v682_v39 = vmul.f32 %v1065_v38, %v681_v36  ;;  %v291_v38 = vadd.f32 %v1561_v11, %v1489_v7  ;;  %v908_v7 = vld [vmem:[%s1805_s3 + $0x60] sm:$0xff]  ;;  %v907_v11 = vld [vmem:[%s1805_s3 + $0x58] sm:$0xff] }
 0x5f7   :  { %v684_v41 = vadd.f32 %v683_v40, %v682_v39 }
 0x5f9   :  { %701 = vmatmul.f32.vlgmr.msrb.gmra.mxu2 %v684_v41  ;;  %721 = vmatmul.f32.vlgmr.msrb.gmra.mxu3 %v684_v41 }
 0x67c   :  { %v702_v43 = vpop.f32.mrf.mxu2  ;;  %v722_v50 = vpop.f32.mrf.mxu3 }
 0x67d   :  { %v725_v44 = vadd.f32 %v702_v43, %v285_v42  ;;  %v745_v8 = vadd.f32 %v722_v50, %v1566_v13  ;;  %v910_v42 = vld [vmem:[%s1805_s3 + $0x70] sm:$0xff]  ;;  %v909_v43 = vld [vmem:[%s1805_s3 + $0x68] sm:$0xff] }
 0x67f   :  { %v1017_v45 = vmul.f32 -1.442695, %v725_v44 }
 0x681   :  { %1066 = vpow2.f32 %v1017_v45  ;;  %v906_v45 = vld [vmem:[%s1805_s3 + $0x50] sm:$0xff] }
 0x687   :  { %v1067_v27 = vpop.eup %1066 }
 0x688   :  { %v729_v46 = vadd.f32 1.0, %v1067_v27 }
 0x68a   :  { %1068 = vrcp.f32 %v729_v46  ;;  %v741_v14 = vand.u32 2147483648, %v729_v46  ;;  %v739_v15 = vand.u32 2147483647, %v729_v46  ;;  %vm735_vm8 = vweird.f32 %v729_v46 }
 0x68c   :  { %v742_v51 = vor.u32 1.1754944e-38, %v741_v14  ;;  %vm740_vm10 = vcmp.eq.f32.partialorder %v739_v15, 8.507059e+37  ;;  %v901_v15 = vld [vmem:[%s1805_s3 + $0x28] sm:$0xff] }
 0x690   :  { %v1069_v48 = vpop.eup %1068 }
 0x691   :  { %v731_v28 = vmul.f32 %v1069_v48, %v729_v46  ;;  %vm736_vm7 = vweird.f32 %v1069_v48  ;;  %v905_v46 = vld [vmem:[%s1805_s3 + $0x48] sm:$0xff] }
 0x692   :  { %vm737_vm9 = vmor %vm735_vm8, %vm736_vm7 }
 0x693   :  { %v732_v49 = vsub.f32 1.0, %v731_v28  ;;  %v903_v28 = vld [vmem:[%s1805_s3 + $0x38] sm:$0xff] }
 0x695   :  { %v733_v30 = vmul.f32 %v1069_v48, %v732_v49  ;;  %v902_v49 = vld [vmem:[%s1805_s3 + $0x30] sm:$0xff] }
 0x697   :  { %v734_v33 = vadd.f32 %v1069_v48, %v733_v30 }
 0x699   :  { %v738_v16 = vsel %vm737_vm9, %v1069_v48, %v734_v33  ;;  %v904_v48 = vld [vmem:[%s1805_s3 + $0x40] sm:$0xff] }
 0x69a   :  { %v743_v2 = vsel %vm740_vm10, %v742_v51, %v738_v16  ;;  %v900_v33 = vld [vmem:[%s1805_s3 + $0x20] sm:$0xff] }
 0x69b   :  { %749 = vrot.lane.b32.xlu1 %v743_v2, %s1173_s27  ;;  %v746_v20 = vmul.f32 %v745_v8, %v743_v2  ;;  %v899_v2 = vld [vmem:[%s1805_s3 + $0x18] sm:$0xff] }
 0x69d   :  { %v747_v22 = vadd.f32 %v746_v20, %v326_v18 }
 0x69f   :  { %1070 = vtanh.f32 %v747_v22 }
 0x6a5   :  { %v1071_v63 = vpop.eup %1070 }
 0x70d   :  { %v750_v24 = vpop.permute.xlu1 %749 }
 0x70e   :  { %v751_v54 = vsub.f32 1.0, %v750_v24  ;;  %v753_v9 = vmul.f32 %v750_v24, %v684_v41  ;;  %v911_v41 = vld [vmem:[%s1805_s3 + $0x78] sm:$0xff] }
 0x70f   :  { %912 = vmatpush.msra.mxu0 %v911_v41 }
 0x710   :  { %v752_v0 = vmul.f32 %v1071_v63, %v751_v54  ;;  %v898_v54 = vld [vmem:[%s1805_s3 + $0x10] sm:$0xff]  ;;  %v897_v63 = vld [vmem:[%s1805_s3 + $0x8] sm:$0xff] }
 0x711   :  { %913 = vmatpush.msra.mxu0 %v910_v42 }
 0x712   :  { %v754_v17 = vadd.f32 %v753_v9, %v752_v0  ;;  %v896_v0 = vld [vmem:[%s1805_s3] sm:$0xff] }
 0x713   :  { %914 = vmatpush.msra.mxu0 %v909_v43 }
 0x714   :  { %771 = vmatmul.f32.vlgmr.msrb.gmra.mxu0 %v754_v17  ;;  %791 = vmatmul.f32.vlgmr.msra.gmra.mxu1 %v754_v17 }
 0x715   :  { %915 = vmatpush.msra.mxu0 %v908_v7 }
 0x717   :  { %916 = vmatpush.msra.mxu0 %v907_v11 }
 0x719   :  { %917 = vmatpush.msra.mxu0 %v906_v45 }
 0x71b   :  { %918 = vmatpush.msra.mxu0 %v905_v46 }
 0x71d   :  { %919 = vmatpush.msra.mxu0 %v904_v48 }
 0x71f   :  { %920 = vmatpush.msra.mxu0 %v903_v28 }
 0x721   :  { %921 = vmatpush.msra.mxu0 %v902_v49 }
 0x723   :  { %922 = vmatpush.msra.mxu0 %v901_v15 }
 0x725   :  { %923 = vmatpush.msra.mxu0 %v900_v33 }
 0x727   :  { %924 = vmatpush.msra.mxu0 %v899_v2 }
 0x729   :  { %925 = vmatpush.msra.mxu0 %v898_v54 }
 0x72b   :  { %926 = vmatpush.msra.mxu0 %v897_v63 }
 0x72d   :  { %927 = vmatpush.msra.mxu0 %v896_v0 }
 0x791   :  { %v772_v23 = vpop.f32.mrf.mxu0  ;;  %v792_v55 = vpop.f32.mrf.mxu1 }
 0x792   :  { %v795_v25 = vadd.f32 %v772_v23, %v288_v19  ;;  %v815_v62 = vadd.f32 %v792_v55, %v1566_v13  ;;  %v332_v23 = vadd.f32 %v1684_v35, %v1570_v21 }
 0x794   :  { %v1018_v3 = vmul.f32 -1.442695, %v795_v25 }
 0x796   :  { %1072 = vpow2.f32 %v1018_v3 }
 0x79c   :  { %v1073_v29 = vpop.eup %1072 }
 0x79d   :  { %v799_v37 = vadd.f32 1.0, %v1073_v29 }
 0x79f   :  { %1074 = vrcp.f32 %v799_v37  ;;  %v811_v4 = vand.u32 2147483648, %v799_v37  ;;  %v809_v53 = vand.u32 2147483647, %v799_v37  ;;  %vm805_vm12 = vweird.f32 %v799_v37 }
 0x7a1   :  { %v812_v57 = vor.u32 1.1754944e-38, %v811_v4  ;;  %vm810_vm14 = vcmp.eq.f32.partialorder %v809_v53, 8.507059e+37  ;;  %v895_v4 = vld [vmem:[%s1806_s4 + $0x2] ss:$0 sm:$0xff] }
 0x7a5   :  { %v1075_v6 = vpop.eup %1074 }
 0x7a6   :  { %v801_v47 = vmul.f32 %v1075_v6, %v799_v37  ;;  %vm806_vm11 = vweird.f32 %v1075_v6 }
 0x7a7   :  { %vm807_vm13 = vmor %vm805_vm12, %vm806_vm11 }
 0x7a8   :  { %v802_v26 = vsub.f32 1.0, %v801_v47 }
 0x7aa   :  { %v803_v52 = vmul.f32 %v1075_v6, %v802_v26 }
 0x7ac   :  { %v804_v56 = vadd.f32 %v1075_v6, %v803_v52 }
 0x7ae   :  { %v808_v58 = vsel %vm807_vm13, %v1075_v6, %v804_v56 }
 0x7af   :  { %v813_v59 = vsel %vm810_vm14, %v812_v57, %v808_v58 }
 0x7b0   :  { %819 = vrot.lane.b32.xlu2 %v813_v59, %s1173_s27  ;;  %v816_v5 = vmul.f32 %v815_v62, %v813_v59 }
 0x7b2   :  { %v817_v1 = vadd.f32 %v816_v5, %v329_v60 }
 0x7b4   :  { %1076 = vtanh.f32 %v817_v1 }
 0x7ba   :  { %v1077_v12 = vpop.eup %1076 }
 0x80a   :  { %v820_v10 = vpop.permute.xlu2 %819 }
 0x80b   :  { %v821_v61 = vsub.f32 1.0, %v820_v10  ;;  %v823_v34 = vmul.f32 %v820_v10, %v754_v17 }
 0x80d   :  { %v822_v31 = vmul.f32 %v1077_v12, %v821_v61 }
 0x80f   :  { %v1737_v36 = vadd.f32 %v823_v34, %v822_v31 }
 0x811   :  { %841 = vmatmul.f32.vlgmr.msra.gmra.mxu2 %v1737_v36  ;;  %861 = vmatmul.f32.vlgmr.msra.gmra.mxu3 %v1737_v36 }
 0x894   :  { %v842_v32 = vpop.f32.mrf.mxu2  ;;  %v862_v9 = vpop.f32.mrf.mxu3 }
 0x895   :  { %v865_v39 = vadd.f32 %v842_v32, %v291_v38  ;;  %v885_v17 = vadd.f32 %v862_v9, %v1566_v13 }
 0x897   :  { %v1019_v40 = vmul.f32 -1.442695, %v865_v39 }
 0x899   :  { %1078 = vpow2.f32 %v1019_v40 }
 0x89f   :  { %v1079_v44 = vpop.eup %1078 }
 0x8a0   :  { %v869_v27 = vadd.f32 1.0, %v1079_v44 }
 0x8a2   :  { %1080 = vrcp.f32 %v869_v27  ;;  %v881_v51 = vand.u32 2147483648, %v869_v27  ;;  %v879_v16 = vand.u32 2147483647, %v869_v27  ;;  %vm875_vm0 = vweird.f32 %v869_v27 }
 0x8a4   :  { %v882_v20 = vor.u32 1.1754944e-38, %v881_v51  ;;  %vm880_vm2 = vcmp.eq.f32.partialorder %v879_v16, 8.507059e+37 }
 0x8a8   :  { %v1081_v14 = vpop.eup %1080 }
 0x8a9   :  { %v871_v30 = vmul.f32 %v1081_v14, %v869_v27  ;;  %vm876_vm15 = vweird.f32 %v1081_v14 }
 0x8aa   :  { %vm877_vm1 = vmor %vm875_vm0, %vm876_vm15 }
 0x8ab   :  { %v872_v50 = vsub.f32 1.0, %v871_v30 }
 0x8ad   :  { %v873_v8 = vmul.f32 %v1081_v14, %v872_v50 }
 0x8af   :  { %v874_v18 = vadd.f32 %v1081_v14, %v873_v8 }
 0x8b1   :  { %v878_v22 = vsel %vm877_vm1, %v1081_v14, %v874_v18 }
 0x8b2   :  { %v883_v24 = vsel %vm880_vm2, %v882_v20, %v878_v22 }
 0x8b3   :  { %889 = vrot.lane.b32.xlu0 %v883_v24, %s1173_s27  ;;  %v886_v19 = vmul.f32 %v885_v17, %v883_v24 }
 0x8b5   :  { %v887_v25 = vadd.f32 %v886_v19, %v332_v23 }
 0x8b7   :  { %1082 = vtanh.f32 %v887_v25 }
 0x8bd   :  { %v1083_v37 = vpop.eup %1082 }
 0x925   :  { %v890_v3 = vpop.permute.xlu0 %889 }
 0x926   :  { %v891_v29 = vsub.f32 1.0, %v890_v3  ;;  %v893_v47 = vmul.f32 %v890_v3, %v1737_v36 }
 0x928   :  { %v892_v6 = vmul.f32 %v1083_v37, %v891_v29 }
 0x92a   :  { %v894_v26 = vadd.f32 %v893_v47, %v892_v6 }
 0x92c   :  { %928 = vmatmul.f32.vlgmr.msra.gmra.mxu0 %v894_v26 }
 0x9a9   :  { %v929_v52 = vpop.f32.mrf.mxu0 }
 0x9aa   :  { %v930_v13 = vadd.f32 %v929_v52, %v895_v4 }
 0x9ac   :  { %v933_v53 = vsel %vm932_vm3, %v930_v13, -inf }
 0x9ad   :  { %934 = vmax.xlane.f32.xlu1 %v933_v53 }
 0xa20   :  { %v935_v21 = vpop.xlane.xlu1 %934 }
 0xa21   :  { %v936_v35 = vsub.f32 %v930_v13, %v935_v21 }
 0xa23   :  { %v937_v55 = vmul.f32 1.442695, %v936_v35 }
 0xa25   :  { %1084 = vpow2.f32 %v937_v55 }
 0xa2b   :  { %v1085_v56 = vpop.eup %1084 }
 0xa2c   :  { %v939_v57 = vsel %vm932_vm3, %v1085_v56, 0.0 }
 0xa2d   :  { %940 = vadd.xlane.f32.xlu2 %v939_v57 }
 0xaa0   :  { %v941_v62 = vpop.xlane.xlu2 %940 }
 0xaa1   :  { %1086 = vlog2.f32 %v941_v62 }
 0xaa7   :  { %v1087_v58 = vpop.eup %1086 }
 0xaa8   :  { %v943_v59 = vmul.f32 0.6931472, %v1087_v58 }
 0xaaa   :  { %v944_v60 = vadd.f32 %v943_v59, %v935_v21 }
 0xaac   :  { %v945_v5 = vsub.f32 %v930_v13, %v944_v60 }
 0xaae   :  { %947 = vst.msk [vmem:[#allocation8] sm:$0x3] %vm946_vm4, %v945_v5 }
 0xaaf   :  { %958 = dma.vmem_to_hbm [thread:$0]  %s954_s23, 32, %s956_s25, [#allocation7]  }
 0xab0   :  { %1165 = dma.done.wait [#allocation7], 32  }
 0xab1   :  { %1166 = vsyncadd [#allocation7], 4294967264 }
 0xab2   :  { %963 = vsyncpa [#allocation6], 1 }
 0xab3   :  { %964 = vsyncpa [#allocation7], 1 }

</bundles_post_ra>
